<compile_context>
chip_gen: v7x
topology: tpu7x:2x2x1
jax: 0.10.0
libtpu: 0.0.40
codegen_flags: <defaults>
</compile_context>

<pallas_src>
import functools

import jax
import jax.numpy as jnp
from jax.experimental import pallas as pl
from jax.experimental.pallas import tpu as pltpu


def _linear_tanh(x_bf16, w_ref, b_ref, act_dtype):
    """y = tanh(x @ W + b): bf16 MXU operands, f32 accumulation.

    On v6e/v7x (bf16 VPU/EUP) the bias-add + tanh run in bf16, so the result
    feeds the next matmul with no extra cast; on v5e `act_dtype` stays f32.
    """
    acc = jnp.dot(x_bf16, w_ref[...], preferred_element_type=jnp.float32)
    y = jnp.tanh((acc + b_ref[...]).astype(act_dtype))
    return y.astype(jnp.bfloat16)


def ae_kernel(x_ref,
              w1_ref, b1_ref, w2_ref, b2_ref,
              w5_ref, b5_ref, w6_ref, b6_ref,
              recon_ref, z_ref,
              *, sub_tiles, act_dtype):
    """Fused 4-layer MLP autoencoder forward for one batch tile.

    The tile is split into `sub_tiles` independent row sub-chains (static
    unroll). The sub-chains share no data, so the LLO scheduler can overlap
    the MXU matmuls of one with the EUP tanh of another, moving runtime from
    sum(MXU, EUP) toward max(MXU, EUP).
    """
    sub_b = x_ref.shape[0] // sub_tiles
    for s in range(sub_tiles):
        rows = pl.ds(s * sub_b, sub_b)
        x = x_ref[rows, :].astype(jnp.bfloat16)   # cast on the VPU, not in XLA

        # encode
        h1 = _linear_tanh(x, w1_ref, b1_ref, act_dtype)
        z = _linear_tanh(h1, w2_ref, b2_ref, act_dtype)
        # decode
        h3 = _linear_tanh(z, w5_ref, b5_ref, act_dtype)
        recon = _linear_tanh(h3, w6_ref, b6_ref, act_dtype)

        z_ref[rows, :] = z.astype(z_ref.dtype)
        recon_ref[rows, :] = recon.astype(recon_ref.dtype)


def _round_up(a, m):
    return ((a + m - 1) // m) * m


def _bf16_elementwise_ok():
    """True on chips with a bf16 VPU/EUP (v6e / v7x); False on v5e & older."""
    try:
        kind = jax.devices()[0].device_kind.lower()
    except Exception:
        return True
    return not any(tag in kind for tag in ("v2", "v3", "v4", "v5"))


def prepare_ae_params(params):
    """One-time cast of the weights to bf16 MXU operands (biases stay f32)."""
    w1, b1, w2, b2, w5, b5, w6, b6 = params
    bf = lambda w: w.astype(jnp.bfloat16)
    return (bf(w1), b1, bf(w2), b2, bf(w5), b5, bf(w6), b6)


def ae_forward(x, prepared_params, *, dim, tile_b=512, out_dtype=jnp.bfloat16):
    """Mimics AE.forward: flattens x to (-1, dim), returns (recon, z)."""
    x2d = x.reshape(-1, dim)
    n = x2d.shape[0]

    w1, b1, w2, b2, w5, b5, w6, b6 = prepared_params
    zd = w2.shape[1]                                   # latent width (256)

    # Clamp the batch tile to the 8-aligned problem size, then cap it so the
    # grid has >= 2 steps whenever possible (keeps both v7x TensorCores busy
    # and lets the pipeline overlap DMA with compute). Padded rows compute
    # harmless values and are sliced off below.
    n_al = _round_up(n, 8)
    tile_b = max(8, min(tile_b, n_al))
    if n_al >= 16 and pl.cdiv(n_al, tile_b) < 2:
        tile_b = _round_up(pl.cdiv(n_al, 2), 8)
    n_pad = pl.cdiv(n, tile_b) * tile_b
    if n_pad != n:
        x2d = jnp.pad(x2d, ((0, n_pad - n), (0, 0)))

    # Interleave two independent row sub-chains inside each tile when the
    # tile is big enough (MXU/EUP overlap); single chain for tiny tiles.
    sub_tiles = 2 if (tile_b % 256 == 0) else 1

    # bf16 bias+tanh on v6e/v7x; f32 on v5e (no bf16 VPU/EUP there).
    act_dtype = jnp.bfloat16 if _bf16_elementwise_ok() else jnp.float32

    # Full-array blocks with constant index maps: weights stay VMEM-resident
    # and are not re-DMA'd per grid step; only x / recon / z are pipelined.
    weight_spec = lambda shape: pl.BlockSpec(shape, lambda i: (0, 0))

    grid_spec = pltpu.PrefetchScalarGridSpec(
        num_scalar_prefetch=0,
        grid=(n_pad // tile_b,),
        in_specs=[
            pl.BlockSpec((tile_b, dim), lambda i: (i, 0)),      # x tile (f32)
            weight_spec(w1.shape), weight_spec(b1.shape),
            weight_spec(w2.shape), weight_spec(b2.shape),
            weight_spec(w5.shape), weight_spec(b5.shape),
            weight_spec(w6.shape), weight_spec(b6.shape),
        ],
        out_specs=[
            pl.BlockSpec((tile_b, dim), lambda i: (i, 0)),      # recon tile
            pl.BlockSpec((tile_b, zd), lambda i: (i, 0)),       # z tile
        ],
    )

    compiler_params = pltpu.CompilerParams(
        dimension_semantics=("parallel",),
        # Only needed for very large tiles (v5e default scoped VMEM is 16 MiB).
        vmem_limit_bytes=(64 * 1024 * 1024 if tile_b > 1024 else None),
    )

    kernel = functools.partial(
        ae_kernel, sub_tiles=sub_tiles, act_dtype=act_dtype)

    recon, z = pl.pallas_call(
        kernel,
        grid_spec=grid_spec,
        out_shape=(
            jax.ShapeDtypeStruct((n_pad, dim), out_dtype),
            jax.ShapeDtypeStruct((n_pad, zd), out_dtype),
        ),
        compiler_params=compiler_params,
    )(x2d, w1, b1, w2, b2, w5, b5, w6, b6)

    return recon[:n], z[:n]


def init_ae_params(key, dim):
    """Deterministic init matching nn.Linear shapes (stored as (in, out), f32)."""
    def linear(k, fan_in, fan_out):
        kw, kb = jax.random.split(k)
        bound = 1.0 / jnp.sqrt(fan_in)
        w = jax.random.uniform(kw, (fan_in, fan_out), jnp.float32, -bound, bound)
        b = jax.random.uniform(kb, (1, fan_out), jnp.float32, -bound, bound)
        return w, b

    k1, k2, k5, k6 = jax.random.split(key, 4)
    w1, b1 = linear(k1, dim, 512)    # fc1
    w2, b2 = linear(k2, 512, 256)    # fc2
    w5, b5 = linear(k5, 256, 512)    # fc5
    w6, b6 = linear(k6, 512, dim)    # fc6
    return (w1, b1, w2, b2, w5, b5, w6, b6)


def ae_reference(x, params_f32, dim):
    """Pure-JAX f32 reference of the PyTorch forward, for verification."""
    w1, b1, w2, b2, w5, b5, w6, b6 = params_f32
    x2d = x.reshape(-1, dim)
    h1 = jnp.tanh(x2d @ w1 + b1)
    z = jnp.tanh(h1 @ w2 + b2)
    h3 = jnp.tanh(z @ w5 + b5)
    recon = jnp.tanh(h3 @ w6 + b6)
    return recon, z


if __name__ == "__main__":
    dim = 128              # AE(dim)
    batch_shape = (2, 9)   # x.view(-1, dim) -> 18 rows: exercises the tile
                           # clamp, the >=2-grid-step path and batch padding.

    key = jax.random.PRNGKey(0)
    kx, kp = jax.random.split(key)
    x = jax.random.normal(kx, (*batch_shape, dim), jnp.float32)
    params_f32 = init_ae_params(kp, dim)
    params = prepare_ae_params(params_f32)     # one-time bf16 weight cast

    recon, z = ae_forward(x, params, dim=dim, tile_b=512)
    recon = jax.block_until_ready(recon)
    z = jax.block_until_ready(z)

    n_rows = batch_shape[0] * batch_shape[1]
    recon_ref, z_ref = ae_reference(x, params_f32, dim)
    assert recon.shape == (n_rows, dim) and z.shape == (n_rows, 256)
    # bf16 MXU operands, (v6e/v7x) bf16 tanh and bf16 outputs -> loosened
    # tolerances vs the f32 reference.
    assert jnp.allclose(recon.astype(jnp.float32), recon_ref, atol=5e-2, rtol=5e-2)
    assert jnp.allclose(z.astype(jnp.float32), z_ref, atol=5e-2, rtol=5e-2)

    print("KERNEL_OK")
</pallas_src>

<mosaic_0001>
module attributes {stable_mosaic.version = 11 : i64} {
  func.func @ae_kernel(%arg0: i32, %arg1: memref<16x128xf32, #tpu.memory_space<vmem>>, %arg2: memref<128x512xbf16, #tpu.memory_space<vmem>>, %arg3: memref<1x512xf32, #tpu.memory_space<vmem>>, %arg4: memref<512x256xbf16, #tpu.memory_space<vmem>>, %arg5: memref<1x256xf32, #tpu.memory_space<vmem>>, %arg6: memref<256x512xbf16, #tpu.memory_space<vmem>>, %arg7: memref<1x512xf32, #tpu.memory_space<vmem>>, %arg8: memref<512x128xbf16, #tpu.memory_space<vmem>>, %arg9: memref<1x128xf32, #tpu.memory_space<vmem>>, %arg10: memref<16x128xbf16, #tpu.memory_space<vmem>>, %arg11: memref<16x256xbf16, #tpu.memory_space<vmem>>) attributes {dimension_semantics = [#tpu.dimension_semantics<parallel>], iteration_bounds = array<i64: 2>, scalar_prefetch = 0 : i64, scratch_operands = 0 : i64, tpu.core_type = #tpu.core_type<tc>, window_params = [{transform_indices = @transform_0, window_bounds = array<i64: 16, 128>}, {pipeline_mode = #tpu.pipeline_mode<synchronous>, transform_indices = @transform_1, window_bounds = array<i64: 128, 512>}, {pipeline_mode = #tpu.pipeline_mode<synchronous>, transform_indices = @transform_2, window_bounds = array<i64: 1, 512>}, {pipeline_mode = #tpu.pipeline_mode<synchronous>, transform_indices = @transform_3, window_bounds = array<i64: 512, 256>}, {pipeline_mode = #tpu.pipeline_mode<synchronous>, transform_indices = @transform_4, window_bounds = array<i64: 1, 256>}, {pipeline_mode = #tpu.pipeline_mode<synchronous>, transform_indices = @transform_5, window_bounds = array<i64: 256, 512>}, {pipeline_mode = #tpu.pipeline_mode<synchronous>, transform_indices = @transform_6, window_bounds = array<i64: 1, 512>}, {pipeline_mode = #tpu.pipeline_mode<synchronous>, transform_indices = @transform_7, window_bounds = array<i64: 512, 128>}, {pipeline_mode = #tpu.pipeline_mode<synchronous>, transform_indices = @transform_8, window_bounds = array<i64: 1, 128>}, {transform_indices = @transform_9, window_bounds = array<i64: 16, 128>}, {transform_indices = @transform_10, window_bounds = array<i64: 16, 256>}]} {
    %c0 = arith.constant 0 : index
    %c0_0 = arith.constant 0 : index
    %0 = vector.load %arg1[%c0, %c0_0] : memref<16x128xf32, #tpu.memory_space<vmem>>, vector<16x128xf32>
    %1 = arith.truncf %0 : vector<16x128xf32> to vector<16x128xbf16>
    %c0_1 = arith.constant 0 : index
    %c0_2 = arith.constant 0 : index
    %2 = vector.load %arg2[%c0_1, %c0_2] : memref<128x512xbf16, #tpu.memory_space<vmem>>, vector<128x512xbf16>
    %cst = arith.constant dense<0.000000e+00> : vector<16x512xf32>
    %3 = tpu.matmul %1, %2, %cst {dimension_numbers = #tpu.dot_dimension_numbers<[1], [0], [0], [1], [0, 0, 1, 1], [], []>} : vector<16x128xbf16>, vector<128x512xbf16>, vector<16x512xf32> -> vector<16x512xf32>
    %c0_3 = arith.constant 0 : index
    %c0_4 = arith.constant 0 : index
    %4 = vector.load %arg3[%c0_3, %c0_4] : memref<1x512xf32, #tpu.memory_space<vmem>>, vector<1x512xf32>
    %5 = vector.broadcast %4 : vector<1x512xf32> to vector<16x512xf32>
    %6 = arith.addf %3, %5 : vector<16x512xf32>
    %7 = arith.truncf %6 : vector<16x512xf32> to vector<16x512xbf16>
    %8 = math.tanh %7 : vector<16x512xbf16>
    %c0_5 = arith.constant 0 : index
    %c0_6 = arith.constant 0 : index
    %9 = vector.load %arg4[%c0_5, %c0_6] : memref<512x256xbf16, #tpu.memory_space<vmem>>, vector<512x256xbf16>
    %cst_7 = arith.constant dense<0.000000e+00> : vector<16x256xf32>
    %10 = tpu.matmul %8, %9, %cst_7 {dimension_numbers = #tpu.dot_dimension_numbers<[1], [0], [0], [1], [0, 0, 1, 1], [], []>} : vector<16x512xbf16>, vector<512x256xbf16>, vector<16x256xf32> -> vector<16x256xf32>
    %c0_8 = arith.constant 0 : index
    %c0_9 = arith.constant 0 : index
    %11 = vector.load %arg5[%c0_8, %c0_9] : memref<1x256xf32, #tpu.memory_space<vmem>>, vector<1x256xf32>
    %12 = vector.broadcast %11 : vector<1x256xf32> to vector<16x256xf32>
    %13 = arith.addf %10, %12 : vector<16x256xf32>
    %14 = arith.truncf %13 : vector<16x256xf32> to vector<16x256xbf16>
    %15 = math.tanh %14 : vector<16x256xbf16>
    %c0_10 = arith.constant 0 : index
    %c0_11 = arith.constant 0 : index
    %16 = vector.load %arg6[%c0_10, %c0_11] : memref<256x512xbf16, #tpu.memory_space<vmem>>, vector<256x512xbf16>
    %cst_12 = arith.constant dense<0.000000e+00> : vector<16x512xf32>
    %17 = tpu.matmul %15, %16, %cst_12 {dimension_numbers = #tpu.dot_dimension_numbers<[1], [0], [0], [1], [0, 0, 1, 1], [], []>} : vector<16x256xbf16>, vector<256x512xbf16>, vector<16x512xf32> -> vector<16x512xf32>
    %c0_13 = arith.constant 0 : index
    %c0_14 = arith.constant 0 : index
    %18 = vector.load %arg7[%c0_13, %c0_14] : memref<1x512xf32, #tpu.memory_space<vmem>>, vector<1x512xf32>
    %19 = vector.broadcast %18 : vector<1x512xf32> to vector<16x512xf32>
    %20 = arith.addf %17, %19 : vector<16x512xf32>
    %21 = arith.truncf %20 : vector<16x512xf32> to vector<16x512xbf16>
    %22 = math.tanh %21 : vector<16x512xbf16>
    %c0_15 = arith.constant 0 : index
    %c0_16 = arith.constant 0 : index
    %23 = vector.load %arg8[%c0_15, %c0_16] : memref<512x128xbf16, #tpu.memory_space<vmem>>, vector<512x128xbf16>
    %cst_17 = arith.constant dense<0.000000e+00> : vector<16x128xf32>
    %24 = tpu.matmul %22, %23, %cst_17 {dimension_numbers = #tpu.dot_dimension_numbers<[1], [0], [0], [1], [0, 0, 1, 1], [], []>} : vector<16x512xbf16>, vector<512x128xbf16>, vector<16x128xf32> -> vector<16x128xf32>
    %c0_18 = arith.constant 0 : index
    %c0_19 = arith.constant 0 : index
    %25 = vector.load %arg9[%c0_18, %c0_19] : memref<1x128xf32, #tpu.memory_space<vmem>>, vector<1x128xf32>
    %26 = vector.broadcast %25 : vector<1x128xf32> to vector<16x128xf32>
    %27 = arith.addf %24, %26 : vector<16x128xf32>
    %28 = arith.truncf %27 : vector<16x128xf32> to vector<16x128xbf16>
    %29 = math.tanh %28 : vector<16x128xbf16>
    %c0_20 = arith.constant 0 : index
    %c0_21 = arith.constant 0 : index
    %30 = vector.load %arg11[%c0_20, %c0_21] : memref<16x256xbf16, #tpu.memory_space<vmem>>, vector<16x256xbf16>
    tpu.vector_store %arg11[%c0_20, %c0_21], %15 {strides = array<i32>} : memref<16x256xbf16, #tpu.memory_space<vmem>>, vector<16x256xbf16>,
    %c0_22 = arith.constant 0 : index
    %c0_23 = arith.constant 0 : index
    %31 = vector.load %arg10[%c0_22, %c0_23] : memref<16x128xbf16, #tpu.memory_space<vmem>>, vector<16x128xbf16>
    tpu.vector_store %arg10[%c0_22, %c0_23], %29 {strides = array<i32>} : memref<16x128xbf16, #tpu.memory_space<vmem>>, vector<16x128xbf16>,
    return
  }
  func.func @transform_0(%arg0: i32) -> (i32, i32) {
    %c0_i32 = arith.constant 0 : i32
    %c0_i32_0 = arith.constant 0 : i32
    return %arg0, %c0_i32 : i32, i32
  }
  func.func @transform_1(%arg0: i32) -> (i32, i32) {
    %c0_i32 = arith.constant 0 : i32
    %c0_i32_0 = arith.constant 0 : i32
    %c0_i32_1 = arith.constant 0 : i32
    return %c0_i32, %c0_i32_0 : i32, i32
  }
  func.func @transform_2(%arg0: i32) -> (i32, i32) {
    %c0_i32 = arith.constant 0 : i32
    %c0_i32_0 = arith.constant 0 : i32
    %c0_i32_1 = arith.constant 0 : i32
    return %c0_i32, %c0_i32_0 : i32, i32
  }
  func.func @transform_3(%arg0: i32) -> (i32, i32) {
    %c0_i32 = arith.constant 0 : i32
    %c0_i32_0 = arith.constant 0 : i32
    %c0_i32_1 = arith.constant 0 : i32
    return %c0_i32, %c0_i32_0 : i32, i32
  }
  func.func @transform_4(%arg0: i32) -> (i32, i32) {
    %c0_i32 = arith.constant 0 : i32
    %c0_i32_0 = arith.constant 0 : i32
    %c0_i32_1 = arith.constant 0 : i32
    return %c0_i32, %c0_i32_0 : i32, i32
  }
  func.func @transform_5(%arg0: i32) -> (i32, i32) {
    %c0_i32 = arith.constant 0 : i32
    %c0_i32_0 = arith.constant 0 : i32
    %c0_i32_1 = arith.constant 0 : i32
    return %c0_i32, %c0_i32_0 : i32, i32
  }
  func.func @transform_6(%arg0: i32) -> (i32, i32) {
    %c0_i32 = arith.constant 0 : i32
    %c0_i32_0 = arith.constant 0 : i32
    %c0_i32_1 = arith.constant 0 : i32
    return %c0_i32, %c0_i32_0 : i32, i32
  }
  func.func @transform_7(%arg0: i32) -> (i32, i32) {
    %c0_i32 = arith.constant 0 : i32
    %c0_i32_0 = arith.constant 0 : i32
    %c0_i32_1 = arith.constant 0 : i32
    return %c0_i32, %c0_i32_0 : i32, i32
  }
  func.func @transform_8(%arg0: i32) -> (i32, i32) {
    %c0_i32 = arith.constant 0 : i32
    %c0_i32_0 = arith.constant 0 : i32
    %c0_i32_1 = arith.constant 0 : i32
    return %c0_i32, %c0_i32_0 : i32, i32
  }
  func.func @transform_9(%arg0: i32) -> (i32, i32) {
    %c0_i32 = arith.constant 0 : i32
    %c0_i32_0 = arith.constant 0 : i32
    return %arg0, %c0_i32 : i32, i32
  }
  func.func @transform_10(%arg0: i32) -> (i32, i32) {
    %c0_i32 = arith.constant 0 : i32
    %c0_i32_0 = arith.constant 0 : i32
    return %arg0, %c0_i32 : i32, i32
  }
}

</mosaic_0001>

<bundles_post_ra>
// kernel: tpu_custom_call.1
= control target key start
LH: loop header
LB: loop body
LE: loop exit
PB: predicated region body
PF: predicated region fallthrough
CT: control target
= control target key end

     0   :  { %s3672_s0 = inlined_call_operand.hbm [shape: f32[32,128], index: 0, kind: input, shape index: {}]   ;;  %s3673_s1 = inlined_call_operand.hbm [shape: bf16[128,512], index: 1, kind: input, shape index: {}]   ;;  %s3674_s2 = inlined_call_operand.vmem [shape: f32[1,512], index: 2, kind: input, shape index: {}]   ;;  %s3675_s3 = inlined_call_operand.hbm [shape: bf16[512,256], index: 3, kind: input, shape index: {}]   ;;  %s3676_s4 = inlined_call_operand.vmem [shape: f32[1,256], index: 4, kind: input, shape index: {}]   ;;  %s3677_s5 = inlined_call_operand.hbm [shape: bf16[256,512], index: 5, kind: input, shape index: {}]   ;;  %s3678_s6 = inlined_call_operand.vmem [shape: f32[1,512], index: 6, kind: input, shape index: {}]   ;;  %s3679_s7 = inlined_call_operand.hbm [shape: bf16[512,128], index: 7, kind: input, shape index: {}]   ;;  %s3680_s8 = inlined_call_operand.vmem [shape: f32[1,128], index: 8, kind: input, shape index: {}]   ;;  %s3681_s9 = inlined_call_operand.hbm [shape: bf16[32,128], index: 9, kind: output, shape index: {0}]   ;;  %s3682_s10 = inlined_call_operand.hbm [shape: bf16[32,256], index: 10, kind: output, shape index: {1}]  }
   0x1   :  { %3689 = sst [smem:[#allocation21_spill]] %s3680_s8 }
   0x2   :  { %3690 = sst [smem:[#allocation22_spill]] %s3681_s9 }
   0x3   :  { %16 = vsyncpa [#allocation3], 0 }
   0x4   :  { %18 = vsyncpa [#allocation3 + $0x1], 0 }
   0x5   :  { %19 = vsyncpa [#allocation6], 0 }
   0x6   :  { %20 = vsyncpa [#allocation9], 0 }
   0x7   :  { %21 = vsyncpa [#allocation4], 0 }
   0x8   :  { %23 = vsyncpa [#allocation4 + $0x1], 0 }
   0x9   :  { %24 = vsyncpa [#allocation13], 0 }
   0xa   :  { %26 = vsyncpa [#allocation13 + $0x1], 0  ;;  %s3295_s13 = smov 0   ;;  %s3297_s14 = smov 0  }
   0xb   :  { %s3299_s15 = smov 0   ;;  %s3301_s16 = smov 0  }
   0xc LB: > { %3691 = sst [smem:[#allocation19_spill]] %s3208_s13  ;;  %s3316_s17 = sadd.s32 4294967295, %s3220_s16   ;;  %s3220_s16 = sphi %s3301_s16, %s3716_s16   ;;  %s3216_s15 = sphi %s3299_s15, %s3715_s15   ;;  %s3212_s14 = sphi %s3297_s14, %s3714_s14   ;;  %s3208_s13 = sphi %s3295_s13, %s3713_s13  }
   0xd   : > { %s2295_s18 = sadd.s32 4294967294, %s3220_s16   ;;  %p52_p0 = scmp.ne.s32.totalorder %s3212_s14, %s3208_s13 }
   0xe   : > { %p3683_p1 = scmp.eq.s32.totalorder %s3316_s17, 0  ;;  %p250_p3 = scmp.eq.s32.totalorder %s2295_s18, 1 }
   0xf   : > { %p2296_p5 = scmp.ge.s32.totalorder %s3220_s16, 1  ;;  %p283_p7 = scmp.lt.s32.totalorder %s3220_s16, 3 }
  0x10   : > { %p3325_p4 = por %p3683_p1, %p52_p0  ;;  %p3330_p6 = por %p250_p3, %p52_p0 }
  0x11   : > { %p3335_p8 = pnand %p2296_p5, %p283_p7  ;;  %s3222_s22 = smov [#allocation5]  }
  0x12   : > { %s3692_s19 = scalar_select %p3325_p4, 1, 0 }
  0x13   : > { %s3693_s20 = scalar_select %p3330_p6, 1, 0 }
  0x14   : > { %s3695_s21 = scalar_select %p3335_p8, 1, 0 }
  0x15   : > { %3694 = sst [smem:[#allocation20_spill]] %s3693_s20  ;;  %s295_s23 = sshll.u32 %s3222_s22, 4  ;;  %s3339_s23 = int_to_ptr.vmem [resolvable:$true] %s295_s23 }
  0x16   : > { %p2597_p9 = pneg %p3335_p8  ;;  %s3223_s25 = smov [#allocation8]  }
  0x17   : > { %s327_s26 = sshll.u32 %s3223_s25, 4  ;;  %s3224_s27 = smov [#allocation7]   ;;  %s3350_s26 = int_to_ptr.vmem [resolvable:$true] %s327_s26 }
  0x18   : > { %p3346_p11 = pnand %p2597_p9, %p3683_p1  ;;  %s3352_s28 = sshll.u32 %s3224_s27, 4  ;;  %s312_s28 = int_to_ptr.vmem [resolvable:$true] %s3352_s28 }
  0x19   : > { %s2972_s11 = scalar_lea.hbm %s3673_s1, 4096 }
  0x1a   : > { %p2973_p12 = scmp.ne.s32.totalorder %s3673_s1, %s2972_s11  ;;  %p3362_p13 = pneg %p3346_p11 }
  0x1b   : > { %p2979_p5 = scmp.lt.u32.totalorder %s2972_s11, %s3673_s1 }
  0x1c   : > { %p2975_p0 = pnand %p3362_p13, %p2973_p12 }
  0x1e   : > { %p2976_p3 = pneg %p2975_p0 }
  0x20   : > { %p2981_p7 = pnand %p2979_p5, %p2976_p3 }
  0x22   : > { %2984 = shalt.err (!%p2981_p7)
}
  0x23   : > { %s2985_s29 = scalar_lea.vmem %s3339_s23, 4096  ;;  %p2993_p2 = scmp.lt.s32.totalorder %s3339_s23, %s3339_s23 }
  0x24   : > { %p2986_p9 = scmp.ne.s32.totalorder %s3339_s23, %s2985_s29  ;;  %p2994_p6 = scmp.lt.s32.totalorder %s2985_s29, %s2985_s29 }
  0x26   : > { %p2988_p10 = pnand %p2986_p9, %p3362_p13  ;;  %p2995_p12 = por %p2994_p6, %p2993_p2 }
  0x28   : > { %p2989_p1 = pneg %p2988_p10 }
  0x2a   : > { %p2996_p0 = pnand %p2995_p12, %p2989_p1 }
  0x2c   : > { %2999 = shalt.err (!%p2996_p0)
}
  0x2d   : > { %s3225_s30 = smov 256   ;;  %s3226_s11 = smov 16  }
  0x2e   : > { %2600 = dma.hbm_to_vmem [thread:$0]  (!%p3346_p11), %s3673_s1, 4096, %s3339_s23, [#allocation6], %s3225_s30, %s3225_s30, %s3226_s11  }
  0x2f   : > { %s3000_s20 = scalar_lea.hbm %s3677_s5, 8192 }
  0x30   : > { %p3001_p2 = scmp.ne.s32.totalorder %s3677_s5, %s3000_s20  ;;  %p3007_p10 = scmp.lt.u32.totalorder %s3000_s20, %s3677_s5 }
  0x32   : > { %p3003_p1 = pnand %p3001_p2, %p3362_p13 }
  0x34   : > { %p3004_p6 = pneg %p3003_p1 }
  0x36   : > { %p3009_p3 = pnand %p3007_p10, %p3004_p6 }
  0x38   : > { %3012 = shalt.err (!%p3009_p3)
}
  0x39   : > { %s3013_s23 = scalar_lea.vmem %s3350_s26, 8192  ;;  %p3021_p12 = scmp.lt.s32.totalorder %s3350_s26, %s3350_s26 }
  0x3a   : > { %p3014_p5 = scmp.ne.s32.totalorder %s3350_s26, %s3013_s23  ;;  %p3022_p0 = scmp.lt.s32.totalorder %s3013_s23, %s3013_s23 }
  0x3c   : > { %p3016_p7 = pnand %p3014_p5, %p3362_p13  ;;  %p3023_p2 = por %p3022_p0, %p3021_p12 }
  0x3e   : > { %p3017_p9 = pneg %p3016_p7 }
  0x40   : > { %p3024_p1 = pnand %p3023_p2, %p3017_p9 }
  0x42   : > { %3027 = shalt.err (!%p3024_p1)
}
  0x43   : > { %2606 = dma.hbm_to_vmem [thread:$0]  (!%p3346_p11), %s3677_s5, 8192, %s3350_s26, [#allocation9], %s3225_s30, %s3225_s30, %s3226_s11  }
  0x44   : > { %s3028_s12 = scalar_lea.hbm %s3675_s3, 8192 }
  0x45   : > { %p3029_p6 = scmp.ne.s32.totalorder %s3675_s3, %s3028_s12  ;;  %p3035_p5 = scmp.lt.u32.totalorder %s3028_s12, %s3675_s3 }
  0x47   : > { %p3031_p10 = pnand %p3029_p6, %p3362_p13 }
  0x49   : > { %p3032_p3 = pneg %p3031_p10 }
  0x4b   : > { %p3037_p7 = pnand %p3035_p5, %p3032_p3 }
  0x4d   : > { %3040 = shalt.err (!%p3037_p7)
}
  0x4e   : > { %s3041_s23 = scalar_lea.vmem %s312_s28, 8192  ;;  %p3049_p2 = scmp.lt.s32.totalorder %s312_s28, %s312_s28 }
  0x4f   : > { %p3042_p9 = scmp.ne.s32.totalorder %s312_s28, %s3041_s23  ;;  %p3050_p1 = scmp.lt.s32.totalorder %s3041_s23, %s3041_s23 }
  0x51   : > { %p3044_p12 = pnand %p3042_p9, %p3362_p13  ;;  %p3051_p4 = por %p3050_p1, %p3049_p2 }
  0x53   : > { %p3045_p0 = pneg %p3044_p12 }
  0x55   : > { %p3052_p8 = pnand %p3051_p4, %p3045_p0 }
  0x57   : > { %3055 = shalt.err (!%p3052_p8)
}
  0x58   : > { %s3227_s26 = smov 128   ;;  %s3228_s30 = smov 8  }
  0x59   : > { %2603 = dma.hbm_to_vmem [thread:$0]  (!%p3346_p11), %s3675_s3, 8192, %s312_s28, [#allocation6], %s3227_s26, %s3227_s26, %s3228_s30  }
  0x5a   : > { %s3229_s9 = smov [#allocation10]   ;;  %s3056_s18 = scalar_lea.hbm %s3679_s7, 4096 }
  0x5b   : > { %s343_s13 = sshll.u32 %s3229_s9, 4  ;;  %p3057_p4 = scmp.ne.s32.totalorder %s3679_s7, %s3056_s18  ;;  %s344_s13 = int_to_ptr.vmem [resolvable:$true] %s343_s13 }
  0x5c   : > { %p3063_p10 = scmp.lt.u32.totalorder %s3056_s18, %s3679_s7 }
  0x5d   : > { %p3059_p8 = pnand %p3057_p4, %p3362_p13 }
  0x5f   : > { %p3060_p6 = pneg %p3059_p8 }
  0x61   : > { %p3065_p3 = pnand %p3063_p10, %p3060_p6 }
  0x63   : > { %3068 = shalt.err (!%p3065_p3)
}
  0x64   : > { %s3069_s28 = scalar_lea.vmem %s344_s13, 4096  ;;  %p3077_p12 = scmp.lt.s32.totalorder %s344_s13, %s344_s13 }
  0x65   : > { %p3070_p5 = scmp.ne.s32.totalorder %s344_s13, %s3069_s28  ;;  %p3078_p0 = scmp.lt.s32.totalorder %s3069_s28, %s3069_s28 }
  0x67   : > { %p3072_p7 = pnand %p3070_p5, %p3362_p13  ;;  %p3079_p2 = por %p3078_p0, %p3077_p12 }
  0x69   : > { %p3073_p9 = pneg %p3072_p7 }
  0x6b   : > { %p3080_p1 = pnand %p3079_p2, %p3073_p9 }
  0x6d   : > { %3083 = shalt.err (!%p3080_p1)
}
  0x6e   : > { %s3230_s11 = smov 64   ;;  %s3231_s22 = smov 4  }
  0x6f   : > { %2609 = dma.hbm_to_vmem [thread:$0]  (!%p3346_p11), %s3679_s7, 4096, %s344_s13, [#allocation9], %s3230_s11, %s3230_s11, %s3231_s22  }
  0x70   : > { %s3447_s20 = sadd.s32 1, %s3220_s16   ;;  %s39_s18 = sadd.s32 1, %s3216_s15 }
  0x71   : > { %s36_s12 = ssub.s32 %s3220_s16, %s3447_s20  ;;  %p46_p4 = scmp.ne.s32.totalorder %s3216_s15, %s3212_s14 }
  0x72   : > { %p37_p13 = scmp.eq.s32.totalorder %s36_s12, 0  ;;  %p47_p8 = scmp.eq.s32.totalorder %s3220_s16, 0 }
  0x73   : > { %p3698_p10 = scmp.eq.s32.totalorder %s3316_s17, 1  ;;  %p2625_p5 = scmp.lt.s32.totalorder %s3220_s16, 2 }
  0x74   : > { %s3456_s25 = scalar_select %p37_p13, %s3216_s15, %s39_s18  }
  0x75   : > { %p48_p6 = por %p47_p8, %p46_p4  ;;  %p3460_p3 = por %p3698_p10, %p46_p4 }
  0x76   : > { %s360_s24 = sand.u32 1, %s3216_s15   ;;  %s2519_s13 = sshll.u32 %s3220_s16, 8 }
  0x77   : > { %s2302_s29 = sshll.u32 %s360_s24, 4  ;;  %s3470_s11 = scalar_lea.hbm %s3672_s0, %s2519_s13 }
  0x78   : > { %s364_s22 = scalar_lea.vmem [#allocation2], %s2302_s29  ;;  %p3474_p11 = pnand %p2625_p5, %p48_p6 }
  0x79   : > { %s371_s8 = sshll.u32 %s364_s22, 4  ;;  %s3478_s12 = scalar_lea.sflag [#allocation3], %s360_s24  ;;  %s3472_s8 = int_to_ptr.vmem [resolvable:$true] %s371_s8 }
  0x7a   : > { %s3084_s18 = scalar_lea.hbm %s3470_s11, 256  ;;  %p3086_p9 = pneg %p3474_p11 }
  0x7b   : > { %p3085_p7 = scmp.ne.s32.totalorder %s3470_s11, %s3084_s18  ;;  %s3089_s23 = scalar_lea.hbm %s3672_s0, 512 }
  0x7c   : > { %p3090_p2 = scmp.lt.u32.totalorder %s3470_s11, %s3672_s0  ;;  %p3091_p1 = scmp.lt.u32.totalorder %s3089_s23, %s3084_s18 }
  0x7d   : > { %p3087_p12 = pnand %p3086_p9, %p3085_p7  ;;  %p3093_p4 = scmp.lt.u32.totalorder %s3084_s18, %s3470_s11 }
  0x7e   : > { %p3092_p13 = por %p3091_p1, %p3090_p2 }
  0x7f   : > { %p3088_p0 = pneg %p3087_p12 }
  0x80   : > { %p3094_p8 = por %p3093_p4, %p3092_p13 }
  0x82   : > { %p3095_p6 = pnand %p3094_p8, %p3088_p0 }
  0x84   : > { %3098 = shalt.err (!%p3095_p6)
}
  0x85   : > { %s3099_s24 = scalar_lea.vmem %s3472_s8, 256  ;;  %s3232_s29 = smov [#allocation2]  }
  0x86   : > { %p3100_p10 = scmp.ne.s32.totalorder %s3472_s8, %s3099_s24  ;;  %s3104_s13 = sshll.u32 %s3232_s29, 4  ;;  %s3105_s13 = int_to_ptr.vmem [resolvable:$false] %s3104_s13 }
  0x87   : > { %s3106_s28 = scalar_lea.vmem %s3105_s13, 512  ;;  %p3107_p12 = scmp.lt.s32.totalorder %s3472_s8, %s3105_s13 }
  0x88   : > { %p3102_p5 = pnand %p3100_p10, %p3086_p9  ;;  %p3108_p2 = scmp.lt.s32.totalorder %s3106_s28, %s3099_s24 }
  0x8a   : > { %p3103_p7 = pneg %p3102_p5  ;;  %p3109_p1 = por %p3108_p2, %p3107_p12 }
  0x8c   : > { %p3110_p13 = pnand %p3109_p1, %p3103_p7 }
  0x8e   : > { %3113 = shalt.err (!%p3110_p13)
}
  0x8f   : > { %2613 = dma.hbm_to_vmem [thread:$0]  (!%p3474_p11), %s3470_s11, 256, %s3472_s8, %s3478_s12, %s3227_s26, %s3227_s26, %s3228_s30  }
  0x90   : > { %p3701_p9 = scmp.ne.s32.totalorder %s3695_s21, 0 }
  0x91   : > { %s3512_s18 = sand.u32 (!%p3701_p9), 1, %s3212_s14   ;;  %p3702_p0 = scmp.ne.s32.totalorder (!%p3701_p9), %s3692_s19, 0 }
  0x92   : > { %383 = sbr.rel (%p3701_p9) target bundleno = 1269 (0x4f5), region = 56  ;;  %s2306_s23 = sshll.u32 (!%p3701_p9), %s3512_s18, 4 }
  0x93   : > { %s386_s22 = scalar_lea.sflag (!%p3701_p9), [#allocation3], %s3512_s18  ;;  %s3518_s9 = scalar_lea.vmem (!%p3701_p9), [#allocation2], %s2306_s23 }
  0x99   : > { %3187 = dma.done.wait (%p3702_p0), %s386_s22, 256  }
  0x9a   : > { %3189 = vsyncadd (%p3702_p0), %s386_s22, 4294967040  ;;  %p3703_p11 = scmp.eq.s32.totalorder %s3316_s17, 0 }
  0x9c   : > { %3191 = dma.done.wait (%p3703_p11), [#allocation6], 12288   ;;  %p3704_p4 = pmov %p3703_p11 }
  0x9e   : > { %3193 = vsyncadd (%p3704_p4), [#allocation6], 4294955008  ;;  %p3705_p8 = pmov %p3704_p4 }
  0x9f   : > { %p3706_p6 = pmov %p3704_p4 }
  0xa0   : > { %3195 = dma.done.wait (%p3705_p8), [#allocation9], 12288  }
  0xa1   : > { %3197 = vsyncadd (%p3706_p6), [#allocation9], 4294955008  ;;  %v3233_v0 = vmov 0   ;;  %v2678_v1 = vld [vmem:[#allocation5 + $0x4] ss:$16 sps:$4 sm:$0xff]   ;;  %v452_v27 = vld [vmem:[%s3518_s9 + $0x8] sm:$0xff] }
  0xa2   : > { %700 = vmatprep.mubr.bf16.mxu0 %v3233_v0  ;;  %743 = vmatprep.mubr.bf16.mxu1 %v3233_v0  ;;  %v2680_v2 = vld [vmem:[#allocation5] ss:$16 sps:$4 sm:$0xff]   ;;  %v2681_v3 = vld [vmem:[#allocation5 + $0x24] ss:$16 sps:$4 sm:$0xff]   ;;  %v2702_v10 = vld [vmem:[#allocation5 + $0xc] ss:$16 sps:$4 sm:$0xff]  }
  0xa3   : > { %668 = vmatprep.subr.bf16.mxu0 %v2678_v1  ;;  %v2683_v4 = vld [vmem:[#allocation5 + $0x20] ss:$16 sps:$4 sm:$0xff]   ;;  %v2684_v5 = vld [vmem:[#allocation5 + $0x44] ss:$16 sps:$4 sm:$0xff]   ;;  %v2704_v11 = vld [vmem:[#allocation5 + $0x8] ss:$16 sps:$4 sm:$0xff]   ;;  %711 = vmatprep.subr.bf16.mxu1 %v2702_v10 }
  0xa4   : > { %669 = vmatpush1.bf16.msra.mxu0 %v2680_v2  ;;  %v2686_v6 = vld [vmem:[#allocation5 + $0x40] ss:$16 sps:$4 sm:$0xff]   ;;  %v2687_v7 = vld [vmem:[#allocation5 + $0x64] ss:$16 sps:$4 sm:$0xff]   ;;  %v2705_v12 = vld [vmem:[#allocation5 + $0x2c] ss:$16 sps:$4 sm:$0xff]   ;;  %712 = vmatpush1.bf16.msra.mxu1 %v2704_v11 }
  0xa5   : > { %670 = vmatprep.subr.bf16.mxu0 %v2681_v3  ;;  %v2689_v8 = vld [vmem:[#allocation5 + $0x60] ss:$16 sps:$4 sm:$0xff]   ;;  %v2690_v9 = vld [vmem:[#allocation5 + $0x84] ss:$16 sps:$4 sm:$0xff]   ;;  %v2707_v14 = vld [vmem:[#allocation5 + $0x28] ss:$16 sps:$4 sm:$0xff]   ;;  %713 = vmatprep.subr.bf16.mxu1 %v2705_v12 }
  0xa6   : > { %v2692_v13 = vld [vmem:[#allocation5 + $0x80] ss:$16 sps:$4 sm:$0xff]   ;;  %v2693_v15 = vld [vmem:[#allocation5 + $0xa4] ss:$16 sps:$4 sm:$0xff]   ;;  %v2708_v16 = vld [vmem:[#allocation5 + $0x4c] ss:$16 sps:$4 sm:$0xff]  }
  0xa7   : > { %v2695_v17 = vld [vmem:[#allocation5 + $0xa0] ss:$16 sps:$4 sm:$0xff]   ;;  %v2710_v18 = vld [vmem:[#allocation5 + $0x48] ss:$16 sps:$4 sm:$0xff]   ;;  %v2696_v19 = vld [vmem:[#allocation5 + $0xc4] ss:$16 sps:$4 sm:$0xff]  }
  0xa8   : > { %671 = vmatpush1.bf16.msra.mxu0 %v2683_v4  ;;  %714 = vmatpush1.bf16.msra.mxu1 %v2707_v14  ;;  %v2711_v20 = vld [vmem:[#allocation5 + $0x6c] ss:$16 sps:$4 sm:$0xff]   ;;  %v2698_v21 = vld [vmem:[#allocation5 + $0xc0] ss:$16 sps:$4 sm:$0xff]   ;;  %v2713_v22 = vld [vmem:[#allocation5 + $0x68] ss:$16 sps:$4 sm:$0xff]  }
  0xa9   : > { %672 = vmatprep.subr.bf16.mxu0 %v2684_v5  ;;  %715 = vmatprep.subr.bf16.mxu1 %v2708_v16  ;;  %v2699_v23 = vld [vmem:[#allocation5 + $0xe4] ss:$16 sps:$4 sm:$0xff]   ;;  %v2714_v24 = vld [vmem:[#allocation5 + $0x8c] ss:$16 sps:$4 sm:$0xff]   ;;  %v2701_v25 = vld [vmem:[#allocation5 + $0xe0] ss:$16 sps:$4 sm:$0xff]  }
  0xaa   : > { %v451_v26 = vld [vmem:[%s3518_s9] sm:$0xff]  ;;  %v2716_v28 = vld [vmem:[#allocation5 + $0x88] ss:$16 sps:$4 sm:$0xff]   ;;  %v2717_v29 = vld [vmem:[#allocation5 + $0xac] ss:$16 sps:$4 sm:$0xff]   ;;  %s3571_s11 = scalar_lea.vmem [#allocation12], %s2306_s23 }
  0xab   : > { %v2728_v30 = vld [vmem:[#allocation7 + $0x4] ss:$8 sps:$4 sm:$0xff]   ;;  %v453_v31 = vpack.c.bf16 %v452_v27, %v451_v26  ;;  %v2719_v32 = vld [vmem:[#allocation5 + $0xa8] ss:$16 sps:$4 sm:$0xff]   ;;  %v2731_v35 = vld [vmem:[#allocation7 + $0x14] ss:$8 sps:$4 sm:$0xff]  }
  0xac   : > { %673 = vmatpush1.bf16.msra.mxu0 %v2686_v6  ;;  %716 = vmatpush1.bf16.msra.mxu1 %v2710_v18  ;;  %v2726_v33 = vld [vmem:[#allocation7] ss:$8 sps:$4 sm:$0xff]   ;;  %v2720_v34 = vld [vmem:[#allocation5 + $0xcc] ss:$16 sps:$4 sm:$0xff]   ;;  %v2729_v37 = vld [vmem:[#allocation7 + $0x10] ss:$8 sps:$4 sm:$0xff]  }
  0xad   : > { %674 = vmatprep.subr.bf16.mxu0 %v2687_v7  ;;  %717 = vmatprep.subr.bf16.mxu1 %v2711_v20  ;;  %v2722_v36 = vld [vmem:[#allocation5 + $0xc8] ss:$16 sps:$4 sm:$0xff]   ;;  %v2723_v38 = vld [vmem:[#allocation5 + $0xec] ss:$16 sps:$4 sm:$0xff]   ;;  %v2822_v5 = vld [vmem:[#allocation8] ss:$16 sps:$4 sm:$0xff]  }
  0xae   : > { %v2734_v39 = vld [vmem:[#allocation7 + $0x24] ss:$8 sps:$4 sm:$0xff]   ;;  %v2725_v40 = vld [vmem:[#allocation5 + $0xe8] ss:$16 sps:$4 sm:$0xff]   ;;  %v2737_v42 = vld [vmem:[#allocation7 + $0x34] ss:$8 sps:$4 sm:$0xff]  }
  0xaf   : > { %v2732_v41 = vld [vmem:[#allocation7 + $0x20] ss:$8 sps:$4 sm:$0xff]   ;;  %v2735_v43 = vld [vmem:[#allocation7 + $0x30] ss:$8 sps:$4 sm:$0xff]   ;;  %v2740_v44 = vld [vmem:[#allocation7 + $0x44] ss:$8 sps:$4 sm:$0xff]  }
  0xb0   : > { %675 = vmatpush1.bf16.msra.mxu0 %v2689_v8  ;;  %718 = vmatpush1.bf16.msra.mxu1 %v2713_v22  ;;  %v2738_v45 = vld [vmem:[#allocation7 + $0x40] ss:$8 sps:$4 sm:$0xff]   ;;  %v2743_v46 = vld [vmem:[#allocation7 + $0x54] ss:$8 sps:$4 sm:$0xff]   ;;  %v2741_v47 = vld [vmem:[#allocation7 + $0x50] ss:$8 sps:$4 sm:$0xff]   ;;  %v488_v22 = vlaneseq }
  0xb1   : > { %676 = vmatprep.subr.bf16.mxu0 %v2690_v9  ;;  %719 = vmatprep.subr.bf16.mxu1 %v2714_v24  ;;  %v2746_v48 = vld [vmem:[#allocation7 + $0x64] ss:$8 sps:$4 sm:$0xff]   ;;  %v2744_v49 = vld [vmem:[#allocation7 + $0x60] ss:$8 sps:$4 sm:$0xff]   ;;  %v2749_v50 = vld [vmem:[#allocation7 + $0x74] ss:$8 sps:$4 sm:$0xff]  }
  0xb2   : > { %v2747_v51 = vld [vmem:[#allocation7 + $0x70] ss:$8 sps:$4 sm:$0xff]   ;;  %v2752_v52 = vld [vmem:[#allocation7 + $0x84] ss:$8 sps:$4 sm:$0xff]   ;;  %v2750_v53 = vld [vmem:[#allocation7 + $0x80] ss:$8 sps:$4 sm:$0xff]  }
  0xb3   : > { %v2755_v54 = vld [vmem:[#allocation7 + $0x94] ss:$8 sps:$4 sm:$0xff]   ;;  %v2753_v55 = vld [vmem:[#allocation7 + $0x90] ss:$8 sps:$4 sm:$0xff]   ;;  %v2758_v56 = vld [vmem:[#allocation7 + $0xa4] ss:$8 sps:$4 sm:$0xff]  }
  0xb4   : > { %677 = vmatpush1.bf16.msra.mxu0 %v2692_v13  ;;  %720 = vmatpush1.bf16.msra.mxu1 %v2716_v28  ;;  %v2756_v57 = vld [vmem:[#allocation7 + $0xa0] ss:$8 sps:$4 sm:$0xff]   ;;  %v2761_v58 = vld [vmem:[#allocation7 + $0xb4] ss:$8 sps:$4 sm:$0xff]   ;;  %v2759_v59 = vld [vmem:[#allocation7 + $0xb0] ss:$8 sps:$4 sm:$0xff]  }
  0xb5   : > { %678 = vmatprep.subr.bf16.mxu0 %v2693_v15  ;;  %721 = vmatprep.subr.bf16.mxu1 %v2717_v29  ;;  %v2764_v60 = vld [vmem:[#allocation7 + $0xc4] ss:$8 sps:$4 sm:$0xff]   ;;  %v2762_v61 = vld [vmem:[#allocation7 + $0xc0] ss:$8 sps:$4 sm:$0xff]   ;;  %v2767_v62 = vld [vmem:[#allocation7 + $0xd4] ss:$8 sps:$4 sm:$0xff]  }
  0xb6   : > { %v2765_v63 = vld [vmem:[#allocation7 + $0xd0] ss:$8 sps:$4 sm:$0xff]   ;;  %v2770_v0 = vld [vmem:[#allocation7 + $0xe4] ss:$8 sps:$4 sm:$0xff]   ;;  %v2768_v1 = vld [vmem:[#allocation7 + $0xe0] ss:$8 sps:$4 sm:$0xff]  }
  0xb7   : > { %v2773_v2 = vld [vmem:[#allocation7 + $0xf4] ss:$8 sps:$4 sm:$0xff]   ;;  %v2771_v3 = vld [vmem:[#allocation7 + $0xf0] ss:$8 sps:$4 sm:$0xff]   ;;  %v2776_v4 = vld [vmem:[#allocation7 + $0x104] ss:$8 sps:$4 sm:$0xff]  }
  0xb8   : > { %679 = vmatpush1.bf16.msra.mxu0 %v2695_v17  ;;  %722 = vmatpush1.bf16.msra.mxu1 %v2719_v32  ;;  %v2824_v6 = vld [vmem:[#allocation8 + $0x4] ss:$16 sps:$4 sm:$0xff]   ;;  %v2825_v8 = vld [vmem:[#allocation8 + $0x20] ss:$16 sps:$4 sm:$0xff]   ;;  %s2522_s24 = sshll.u32 %s3316_s17, 8  ;;  %s2152_s29 = sshll.u32 %s3571_s11, 4  ;;  %s3592_s29 = int_to_ptr.vmem [resolvable:$true] %s2152_s29 }
  0xb9   : > { %680 = vmatprep.subr.bf16.mxu0 %v2696_v19  ;;  %723 = vmatprep.subr.bf16.mxu1 %v2720_v34  ;;  %v2827_v7 = vld [vmem:[#allocation8 + $0x24] ss:$16 sps:$4 sm:$0xff]   ;;  %v2828_v10 = vld [vmem:[#allocation8 + $0x40] ss:$16 sps:$4 sm:$0xff]   ;;  %s3590_s23 = scalar_lea.hbm %s3682_s10, %s2522_s24  ;;  %s2122_s22 = scalar_lea.sflag [#allocation13], %s3512_s18 }
  0xba   : > { %v2830_v9 = vld [vmem:[#allocation8 + $0x44] ss:$16 sps:$4 sm:$0xff]   ;;  %v2831_v12 = vld [vmem:[#allocation8 + $0x60] ss:$16 sps:$4 sm:$0xff]   ;;  %s3114_s9 = scalar_lea.vmem %s3592_s29, 256  ;;  %s3234_s19 = smov [#allocation12]  }
  0xbb   : > { %v2833_v11 = vld [vmem:[#allocation8 + $0x64] ss:$16 sps:$4 sm:$0xff]   ;;  %v2834_v14 = vld [vmem:[#allocation8 + $0x80] ss:$16 sps:$4 sm:$0xff]   ;;  %p3115_p10 = scmp.ne.s32.totalorder %s3592_s29, %s3114_s9  ;;  %s3118_s21 = sshll.u32 %s3234_s19, 4  ;;  %s3119_s21 = int_to_ptr.vmem [resolvable:$false] %s3118_s21 }
  0xbc   : > { %681 = vmatpush1.bf16.msra.mxu0 %v2698_v21  ;;  %724 = vmatpush1.bf16.msra.mxu1 %v2722_v36  ;;  %v2836_v13 = vld [vmem:[#allocation8 + $0x84] ss:$16 sps:$4 sm:$0xff]   ;;  %v2837_v16 = vld [vmem:[#allocation8 + $0xa0] ss:$16 sps:$4 sm:$0xff]   ;;  %s3120_s26 = scalar_lea.vmem %s3119_s21, 512  ;;  %p3121_p12 = scmp.lt.s32.totalorder %s3592_s29, %s3119_s21 }
  0xbd   : > { %682 = vmatprep.subr.bf16.mxu0 %v2699_v23  ;;  %725 = vmatprep.subr.bf16.mxu1 %v2723_v38  ;;  %v2839_v15 = vld [vmem:[#allocation8 + $0xa4] ss:$16 sps:$4 sm:$0xff]   ;;  %v2840_v18 = vld [vmem:[#allocation8 + $0xc0] ss:$16 sps:$4 sm:$0xff]   ;;  %p3116_p5 = pnand %p3115_p10, %p3460_p3  ;;  %p3122_p2 = scmp.lt.s32.totalorder %s3120_s26, %s3114_s9 }
  0xbe   : > { %v2842_v17 = vld [vmem:[#allocation8 + $0xc4] ss:$16 sps:$4 sm:$0xff]   ;;  %v2843_v20 = vld [vmem:[#allocation8 + $0xe0] ss:$16 sps:$4 sm:$0xff]  }
  0xbf   : > { %v2845_v19 = vld [vmem:[#allocation8 + $0xe4] ss:$16 sps:$4 sm:$0xff]   ;;  %v2846_v23 = vld [vmem:[#allocation8 + $0x100] ss:$16 sps:$4 sm:$0xff]   ;;  %p3117_p7 = pneg %p3116_p5  ;;  %p3123_p1 = por %p3122_p2, %p3121_p12 }
  0xc0   : > { %683 = vmatpush1.bf16.msra.mxu0 %v2701_v25  ;;  %726 = vmatpush1.bf16.msra.mxu1 %v2725_v40  ;;  %v2848_v21 = vld [vmem:[#allocation8 + $0x104] ss:$16 sps:$4 sm:$0xff]   ;;  %v3534_v25 = vshrl.u32 %v488_v22, 7  ;;  %v2849_v26 = vld [vmem:[#allocation8 + $0x120] ss:$16 sps:$4 sm:$0xff]  }
  0xc1   : > { %1158 = vmatprep.subr.bf16.mxu0 %v2728_v30  ;;  %1654 = vmatprep.subr.bf16.mxu1 %v2824_v6  ;;  %v2851_v24 = vld [vmem:[#allocation8 + $0x124] ss:$16 sps:$4 sm:$0xff]   ;;  %v486_v29 = vld [vmem:[%s3674_s2] sm:$0xf]  ;;  %p3124_p13 = pnand %p3123_p1, %p3117_p7 }
  0xc2   : > { %v2854_v27 = vld [vmem:[#allocation8 + $0x144] ss:$16 sps:$4 sm:$0xff]   ;;  %v3537_v28 = vsub.s32 0, %v3534_v25  ;;  %v3543_v30 = vsub.s32 1, %v3534_v25 }
  0xc3   : > { %701 = vmatmul.mubr.bf16.vlgmr.msra.gmra.mrb[0].mxu0 %v453_v31  ;;  %744 = vmatmul.mubr.bf16.vlgmr.msra.gmra.mrb[0].mxu1 %v453_v31  ;;  %v2852_v31 = vld [vmem:[#allocation8 + $0x140] ss:$16 sps:$4 sm:$0xff]   ;;  %v2791_v6 = vld [vmem:[#allocation7 + $0x154] ss:$8 sps:$4 sm:$0xff]  }
  0xc4   : > { %1159 = vmatpush1.bf16.msra.mxu0 %v2726_v33  ;;  %1655 = vmatpush1.bf16.msra.mxu1 %v2822_v5  ;;  %v491_v32 = vrot.slane %v486_v29, %v3537_v28  ;;  %v495_v34 = vrot.slane %v486_v29, %v3543_v30  ;;  %v2786_v5 = vld [vmem:[#allocation7 + $0x140] ss:$8 sps:$4 sm:$0xff]   ;;  %v2815_v22 = vld [vmem:[#allocation7 + $0x1d4] ss:$8 sps:$4 sm:$0xff]  }
  0xc5   : > { %1160 = vmatprep.subr.bf16.mxu0 %v2731_v35  ;;  %1656 = vmatprep.subr.bf16.mxu1 %v2827_v7  ;;  %v2789_v7 = vld [vmem:[#allocation7 + $0x150] ss:$8 sps:$4 sm:$0xff]  }
  0xc8   : > { %1161 = vmatpush1.bf16.msra.mxu0 %v2729_v37  ;;  %1657 = vmatpush1.bf16.msra.mxu1 %v2825_v8  ;;  %v2794_v8 = vld [vmem:[#allocation7 + $0x164] ss:$8 sps:$4 sm:$0xff]  }
  0xc9   : > { %1162 = vmatprep.subr.bf16.mxu0 %v2734_v39  ;;  %1658 = vmatprep.subr.bf16.mxu1 %v2830_v9  ;;  %v2792_v9 = vld [vmem:[#allocation7 + $0x160] ss:$8 sps:$4 sm:$0xff]  }
  0xcc   : > { %1163 = vmatpush1.bf16.msra.mxu0 %v2732_v41  ;;  %1659 = vmatpush1.bf16.msra.mxu1 %v2828_v10  ;;  %v2797_v10 = vld [vmem:[#allocation7 + $0x174] ss:$8 sps:$4 sm:$0xff]  }
  0xcd   : > { %1164 = vmatprep.subr.bf16.mxu0 %v2737_v42  ;;  %1660 = vmatprep.subr.bf16.mxu1 %v2833_v11  ;;  %v2795_v11 = vld [vmem:[#allocation7 + $0x170] ss:$8 sps:$4 sm:$0xff]  }
  0xd0   : > { %1165 = vmatpush1.bf16.msra.mxu0 %v2735_v43  ;;  %1661 = vmatpush1.bf16.msra.mxu1 %v2831_v12  ;;  %v498_v43 = vsub.s32 2, %v3534_v25  ;;  %v2800_v12 = vld [vmem:[#allocation7 + $0x184] ss:$8 sps:$4 sm:$0xff]  }
  0xd1   : > { %1166 = vmatprep.subr.bf16.mxu0 %v2740_v44  ;;  %1662 = vmatprep.subr.bf16.mxu1 %v2836_v13  ;;  %v2798_v13 = vld [vmem:[#allocation7 + $0x180] ss:$8 sps:$4 sm:$0xff]  }
  0xd4   : > { %1167 = vmatpush1.bf16.msra.mxu0 %v2738_v45  ;;  %1663 = vmatpush1.bf16.msra.mxu1 %v2834_v14  ;;  %v502_v45 = vsub.s32 3, %v3534_v25  ;;  %v2803_v14 = vld [vmem:[#allocation7 + $0x194] ss:$8 sps:$4 sm:$0xff]  }
  0xd5   : > { %1168 = vmatprep.subr.bf16.mxu0 %v2743_v46  ;;  %1664 = vmatprep.subr.bf16.mxu1 %v2839_v15  ;;  %v499_v46 = vrot.slane %v486_v29, %v498_v43  ;;  %v2801_v15 = vld [vmem:[#allocation7 + $0x190] ss:$8 sps:$4 sm:$0xff]  }
  0xd8   : > { %1169 = vmatpush1.bf16.msra.mxu0 %v2741_v47  ;;  %1665 = vmatpush1.bf16.msra.mxu1 %v2837_v16  ;;  %v503_v47 = vrot.slane %v486_v29, %v502_v45  ;;  %v2806_v16 = vld [vmem:[#allocation7 + $0x1a4] ss:$8 sps:$4 sm:$0xff]   ;;  %v2819_v29 = vld [vmem:[#allocation7 + $0x1f0] ss:$8 sps:$4 sm:$0xff]  }
  0xd9   : > { %1170 = vmatprep.subr.bf16.mxu0 %v2746_v48  ;;  %1666 = vmatprep.subr.bf16.mxu1 %v2842_v17  ;;  %v2804_v17 = vld [vmem:[#allocation7 + $0x1a0] ss:$8 sps:$4 sm:$0xff]  }
  0xdc   : > { %1171 = vmatpush1.bf16.msra.mxu0 %v2744_v49  ;;  %1667 = vmatpush1.bf16.msra.mxu1 %v2840_v18  ;;  %v2809_v18 = vld [vmem:[#allocation7 + $0x1b4] ss:$8 sps:$4 sm:$0xff]  }
  0xdd   : > { %1172 = vmatprep.subr.bf16.mxu0 %v2749_v50  ;;  %1668 = vmatprep.subr.bf16.mxu1 %v2845_v19  ;;  %v2807_v19 = vld [vmem:[#allocation7 + $0x1b0] ss:$8 sps:$4 sm:$0xff]  }
  0xe0   : > { %1173 = vmatpush1.bf16.msra.mxu0 %v2747_v51  ;;  %1669 = vmatpush1.bf16.msra.mxu1 %v2843_v20  ;;  %v2812_v20 = vld [vmem:[#allocation7 + $0x1c4] ss:$8 sps:$4 sm:$0xff]  }
  0xe1   : > { %1174 = vmatprep.subr.bf16.mxu0 %v2752_v52  ;;  %1670 = vmatprep.subr.bf16.mxu1 %v2848_v21  ;;  %v2810_v21 = vld [vmem:[#allocation7 + $0x1c0] ss:$8 sps:$4 sm:$0xff]  }
  0xe4   : > { %1175 = vmatpush1.bf16.msra.mxu0 %v2750_v53  ;;  %1671 = vmatpush1.bf16.msra.mxu1 %v2846_v23  ;;  %v2813_v23 = vld [vmem:[#allocation7 + $0x1d0] ss:$8 sps:$4 sm:$0xff]  }
  0xe5   : > { %1176 = vmatprep.subr.bf16.mxu0 %v2755_v54  ;;  %1672 = vmatprep.subr.bf16.mxu1 %v2851_v24  ;;  %v2818_v24 = vld [vmem:[#allocation7 + $0x1e4] ss:$8 sps:$4 sm:$0xff]  }
  0xe8   : > { %1177 = vmatpush1.bf16.msra.mxu0 %v2753_v55  ;;  %1673 = vmatpush1.bf16.msra.mxu1 %v2849_v26  ;;  %v2816_v26 = vld [vmem:[#allocation7 + $0x1e0] ss:$8 sps:$4 sm:$0xff]  }
  0xe9   : > { %1178 = vmatprep.subr.bf16.mxu0 %v2758_v56  ;;  %1674 = vmatprep.subr.bf16.mxu1 %v2854_v27  ;;  %v2821_v27 = vld [vmem:[#allocation7 + $0x1f4] ss:$8 sps:$4 sm:$0xff]  }
  0xec   : > { %1179 = vmatpush1.bf16.msra.mxu0 %v2756_v57  ;;  %1675 = vmatpush1.bf16.msra.mxu1 %v2852_v31  ;;  %v2774_v57 = vld [vmem:[#allocation7 + $0x100] ss:$8 sps:$4 sm:$0xff]  }
  0xed   : > { %1180 = vmatprep.subr.bf16.mxu0 %v2761_v58 }
  0xf0   : > { %1181 = vmatpush1.bf16.msra.mxu0 %v2759_v59 }
  0xf1   : > { %1182 = vmatprep.subr.bf16.mxu0 %v2764_v60  ;;  %v2779_v60 = vld [vmem:[#allocation7 + $0x114] ss:$8 sps:$4 sm:$0xff]  }
  0xf4   : > { %1183 = vmatpush1.bf16.msra.mxu0 %v2762_v61 }
  0xf5   : > { %1184 = vmatprep.subr.bf16.mxu0 %v2767_v62  ;;  %v2777_v62 = vld [vmem:[#allocation7 + $0x110] ss:$8 sps:$4 sm:$0xff]  }
  0xf8   : > { %1185 = vmatpush1.bf16.msra.mxu0 %v2765_v63  ;;  %v2782_v63 = vld [vmem:[#allocation7 + $0x124] ss:$8 sps:$4 sm:$0xff]  }
  0xf9   : > { %1186 = vmatprep.subr.bf16.mxu0 %v2770_v0  ;;  %v2780_v0 = vld [vmem:[#allocation7 + $0x120] ss:$8 sps:$4 sm:$0xff]  }
  0xfc   : > { %1187 = vmatpush1.bf16.msra.mxu0 %v2768_v1  ;;  %v2785_v1 = vld [vmem:[#allocation7 + $0x134] ss:$8 sps:$4 sm:$0xff]  }
  0xfd   : > { %1188 = vmatprep.subr.bf16.mxu0 %v2773_v2  ;;  %v2783_v2 = vld [vmem:[#allocation7 + $0x130] ss:$8 sps:$4 sm:$0xff]  }
 0x100   : > { %1189 = vmatpush1.bf16.msra.mxu0 %v2771_v3 }
 0x101   : > { %1201 = vmatprep.subr.bf16.mxu0 %v2776_v4  ;;  %v2788_v4 = vld [vmem:[#allocation7 + $0x144] ss:$8 sps:$4 sm:$0xff]  }
 0x196   : > { %v702_v33 = vpop.f32.mrb[0].mxu0  ;;  %v745_v48 = vpop.f32.mrb[0].mxu1 }
 0x197   : > { %v704_v35 = vpop.f32.mrb[1].mxu0  ;;  %v703_v37 = vadd.f32 %v702_v33, %v491_v32  ;;  %v3553_v49 = vadd.f32 %v745_v48, %v499_v46  ;;  %v747_v50 = vpop.f32.mrb[1].mxu1  ;;  %v2855_v33 = vld [vmem:[#allocation8 + $0x160] ss:$16 sps:$4 sm:$0xff]   ;;  %v2921_v48 = vld [vmem:[#allocation10 + $0x8] sm:$0xff]  }
 0x198   : > { %v706_v36 = vpop.f32.mrb[2].mxu0  ;;  %v705_v40 = vadd.f32 %v704_v35, %v495_v34  ;;  %v748_v51 = vadd.f32 %v747_v50, %v503_v47  ;;  %v749_v52 = vpop.f32.mrb[2].mxu1  ;;  %v2858_v35 = vld [vmem:[#allocation8 + $0x180] ss:$16 sps:$4 sm:$0xff]  }
 0x199   : > { %v707_v38 = vadd.f32 %v706_v36, %v491_v32  ;;  %v708_v39 = vpop.f32.mrb[3].mxu0  ;;  %v3555_v53 = vadd.f32 %v749_v52, %v499_v46  ;;  %v751_v54 = vpop.f32.mrb[3].mxu1  ;;  %v2857_v32 = vld [vmem:[#allocation8 + $0x164] ss:$16 sps:$4 sm:$0xff]  }
 0x19a   : > { %v709_v41 = vadd.f32 %v708_v39, %v495_v34  ;;  %v752_v55 = vadd.f32 %v751_v54, %v503_v47  ;;  %1676 = vmatprep.subr.bf16.mxu1 %v2857_v32  ;;  %v2860_v34 = vld [vmem:[#allocation8 + $0x184] ss:$16 sps:$4 sm:$0xff]   ;;  %v2864_v39 = vld [vmem:[#allocation8 + $0x1c0] ss:$16 sps:$4 sm:$0xff]   ;;  %v2920_v47 = vld [vmem:[#allocation10 + $0x48] sm:$0xff]  }
 0x19b   : > { %v754_v42 = vpack.c.bf16 %v707_v38, %v703_v37  ;;  %v756_v56 = vpack.c.bf16 %v3555_v53, %v3553_v49  ;;  %1677 = vmatpush1.bf16.msra.mxu1 %v2855_v33  ;;  %v2863_v36 = vld [vmem:[#allocation8 + $0x1a4] ss:$16 sps:$4 sm:$0xff]   ;;  %v2861_v37 = vld [vmem:[#allocation8 + $0x1a0] ss:$16 sps:$4 sm:$0xff]   ;;  %v2911_v32 = vld [vmem:[#allocation8 + $0x1ac] ss:$16 sps:$4 sm:$0xff]  }
 0x19c   : > { %v755_v44 = vpack.c.bf16 %v709_v41, %v705_v40  ;;  %v757_v58 = vpack.c.bf16 %v752_v55, %v748_v51  ;;  %1678 = vmatprep.subr.bf16.mxu1 %v2860_v34  ;;  %v2866_v38 = vld [vmem:[#allocation8 + $0x1c4] ss:$16 sps:$4 sm:$0xff]   ;;  %v2867_v41 = vld [vmem:[#allocation8 + $0x1e0] ss:$16 sps:$4 sm:$0xff]   ;;  %v2909_v33 = vld [vmem:[#allocation8 + $0x1a8] ss:$16 sps:$4 sm:$0xff]  }
 0x19d   : > { %v2869_v40 = vld [vmem:[#allocation8 + $0x1e4] ss:$16 sps:$4 sm:$0xff]   ;;  %v826_v51 = vld [vmem:[%s3676_s4] sm:$0x3]  ;;  %v2914_v34 = vld [vmem:[#allocation8 + $0x1cc] ss:$16 sps:$4 sm:$0xff]  }
 0x19e   : > { %2950 = vtanh.bf16 %v755_v44  ;;  %v2918_v44 = vld [vmem:[#allocation10 + $0x40] sm:$0xff]   ;;  %v2922_v49 = vld [vmem:[#allocation10 + $0x50] sm:$0xff]   ;;  %v831_v52 = vrot.slane %v826_v51, %v3537_v28  ;;  %v835_v54 = vrot.slane %v826_v51, %v3543_v30 }
 0x19f   : > { %2952 = vtanh.bf16 %v754_v42  ;;  %1679 = vmatpush1.bf16.msra.mxu1 %v2858_v35  ;;  %v2872_v42 = vld [vmem:[#allocation8 + $0xc] ss:$16 sps:$4 sm:$0xff]   ;;  %v2919_v46 = vld [vmem:[#allocation10] sm:$0xff]   ;;  %v2923_v50 = vld [vmem:[#allocation10 + $0x10] sm:$0xff]  }
 0x1a0   : > { %2954 = vtanh.bf16 %v757_v58  ;;  %1680 = vmatprep.subr.bf16.mxu1 %v2863_v36  ;;  %v2912_v35 = vld [vmem:[#allocation8 + $0x1c8] ss:$16 sps:$4 sm:$0xff]   ;;  %v2917_v36 = vld [vmem:[#allocation8 + $0x1ec] ss:$16 sps:$4 sm:$0xff]   ;;  %v2935_v51 = vld [vmem:[#allocation10 + $0x80] sm:$0xff]  }
 0x1a1   : > { %2956 = vtanh.bf16 %v756_v56 }
 0x1a3   : > { %1681 = vmatpush1.bf16.msra.mxu1 %v2861_v37  ;;  %v2915_v37 = vld [vmem:[#allocation8 + $0x1e8] ss:$16 sps:$4 sm:$0xff]  }
 0x1a4   : > { %1682 = vmatprep.subr.bf16.mxu1 %v2866_v38  ;;  %v2924_v38 = vld [vmem:[#allocation10 + $0x58] sm:$0xff]  }
 0x1a7   : > { %1683 = vmatpush1.bf16.msra.mxu1 %v2864_v39  ;;  %v2925_v39 = vld [vmem:[#allocation10 + $0x18] sm:$0xff]  }
 0x1a8   : > { %1684 = vmatprep.subr.bf16.mxu1 %v2869_v40  ;;  %v2926_v40 = vld [vmem:[#allocation10 + $0x60] sm:$0xff]  }
 0x1a9   : > { %v2951_v59 = vpop.eup %2950 }
 0x1aa   : > { %v2953_v61 = vpop.eup %2952  ;;  %1190 = vmatprep.mubr.bf16.mxu0 %v2951_v59 }
 0x1ab   : > { %1191 = vmatmul.mubr.bf16.vlgmr.msra.gmra.mrb[4].mxu0 %v2953_v61  ;;  %v2955_v3 = vpop.eup %2954  ;;  %1685 = vmatpush1.bf16.msra.mxu1 %v2867_v41  ;;  %v2927_v41 = vld [vmem:[#allocation10 + $0x20] sm:$0xff]  }
 0x1ac   : > { %1202 = vmatpush1.bf16.msra.mxu0 %v2774_v57  ;;  %1233 = vmatprep.mubr.bf16.mxu0 %v2955_v3  ;;  %v2957_v31 = vpop.eup %2956  ;;  %v2875_v3 = vld [vmem:[#allocation8 + $0x2c] ss:$16 sps:$4 sm:$0xff]  }
 0x1ad   : > { %1203 = vmatprep.subr.bf16.mxu0 %v2779_v60  ;;  %1697 = vmatprep.subr.bf16.mxu1 %v2872_v42  ;;  %v2928_v42 = vld [vmem:[#allocation10 + $0x68] sm:$0xff]  }
 0x1b0   : > { %1204 = vmatpush1.bf16.msra.mxu0 %v2777_v62 }
 0x1b1   : > { %1205 = vmatprep.subr.bf16.mxu0 %v2782_v63 }
 0x1b4   : > { %1206 = vmatpush1.bf16.msra.mxu0 %v2780_v0 }
 0x1b5   : > { %1207 = vmatprep.subr.bf16.mxu0 %v2785_v1  ;;  %v2870_v1 = vld [vmem:[#allocation8 + $0x8] ss:$16 sps:$4 sm:$0xff]  }
 0x1b8   : > { %1208 = vmatpush1.bf16.msra.mxu0 %v2783_v2 }
 0x1b9   : > { %1209 = vmatprep.subr.bf16.mxu0 %v2788_v4 }
 0x1bc   : > { %1210 = vmatpush1.bf16.msra.mxu0 %v2786_v5 }
 0x1bd   : > { %1211 = vmatprep.subr.bf16.mxu0 %v2791_v6  ;;  %v2873_v6 = vld [vmem:[#allocation8 + $0x28] ss:$16 sps:$4 sm:$0xff]  }
 0x1c0   : > { %1212 = vmatpush1.bf16.msra.mxu0 %v2789_v7  ;;  %v2878_v7 = vld [vmem:[#allocation8 + $0x4c] ss:$16 sps:$4 sm:$0xff]  }
 0x1c1   : > { %1213 = vmatprep.subr.bf16.mxu0 %v2794_v8  ;;  %v2876_v8 = vld [vmem:[#allocation8 + $0x48] ss:$16 sps:$4 sm:$0xff]  }
 0x1c4   : > { %1214 = vmatpush1.bf16.msra.mxu0 %v2792_v9  ;;  %v2881_v9 = vld [vmem:[#allocation8 + $0x6c] ss:$16 sps:$4 sm:$0xff]  }
 0x1c5   : > { %1215 = vmatprep.subr.bf16.mxu0 %v2797_v10  ;;  %v2879_v10 = vld [vmem:[#allocation8 + $0x68] ss:$16 sps:$4 sm:$0xff]  }
 0x1c8   : > { %1216 = vmatpush1.bf16.msra.mxu0 %v2795_v11  ;;  %v2884_v11 = vld [vmem:[#allocation8 + $0x8c] ss:$16 sps:$4 sm:$0xff]  }
 0x1c9   : > { %1217 = vmatprep.subr.bf16.mxu0 %v2800_v12  ;;  %v2882_v12 = vld [vmem:[#allocation8 + $0x88] ss:$16 sps:$4 sm:$0xff]  }
 0x1cc   : > { %1218 = vmatpush1.bf16.msra.mxu0 %v2798_v13  ;;  %v2887_v13 = vld [vmem:[#allocation8 + $0xac] ss:$16 sps:$4 sm:$0xff]  }
 0x1cd   : > { %1219 = vmatprep.subr.bf16.mxu0 %v2803_v14  ;;  %v2885_v14 = vld [vmem:[#allocation8 + $0xa8] ss:$16 sps:$4 sm:$0xff]  }
 0x1d0   : > { %1220 = vmatpush1.bf16.msra.mxu0 %v2801_v15  ;;  %v2890_v15 = vld [vmem:[#allocation8 + $0xcc] ss:$16 sps:$4 sm:$0xff]  }
 0x1d1   : > { %1221 = vmatprep.subr.bf16.mxu0 %v2806_v16  ;;  %v2888_v16 = vld [vmem:[#allocation8 + $0xc8] ss:$16 sps:$4 sm:$0xff]  }
 0x1d4   : > { %1222 = vmatpush1.bf16.msra.mxu0 %v2804_v17  ;;  %v2893_v17 = vld [vmem:[#allocation8 + $0xec] ss:$16 sps:$4 sm:$0xff]  }
 0x1d5   : > { %1223 = vmatprep.subr.bf16.mxu0 %v2809_v18  ;;  %v2891_v18 = vld [vmem:[#allocation8 + $0xe8] ss:$16 sps:$4 sm:$0xff]  }
 0x1d8   : > { %1224 = vmatpush1.bf16.msra.mxu0 %v2807_v19  ;;  %v2896_v19 = vld [vmem:[#allocation8 + $0x10c] ss:$16 sps:$4 sm:$0xff]  }
 0x1d9   : > { %1225 = vmatprep.subr.bf16.mxu0 %v2812_v20  ;;  %v2894_v20 = vld [vmem:[#allocation8 + $0x108] ss:$16 sps:$4 sm:$0xff]  }
 0x1dc   : > { %1226 = vmatpush1.bf16.msra.mxu0 %v2810_v21  ;;  %v2899_v21 = vld [vmem:[#allocation8 + $0x12c] ss:$16 sps:$4 sm:$0xff]  }
 0x1dd   : > { %1227 = vmatprep.subr.bf16.mxu0 %v2815_v22  ;;  %v2897_v22 = vld [vmem:[#allocation8 + $0x128] ss:$16 sps:$4 sm:$0xff]  }
 0x1e0   : > { %1228 = vmatpush1.bf16.msra.mxu0 %v2813_v23  ;;  %v2902_v23 = vld [vmem:[#allocation8 + $0x14c] ss:$16 sps:$4 sm:$0xff]  }
 0x1e1   : > { %1229 = vmatprep.subr.bf16.mxu0 %v2818_v24  ;;  %v2900_v24 = vld [vmem:[#allocation8 + $0x148] ss:$16 sps:$4 sm:$0xff]  }
 0x1e4   : > { %1230 = vmatpush1.bf16.msra.mxu0 %v2816_v26  ;;  %v2905_v26 = vld [vmem:[#allocation8 + $0x16c] ss:$16 sps:$4 sm:$0xff]  }
 0x1e5   : > { %1231 = vmatprep.subr.bf16.mxu0 %v2821_v27  ;;  %v2903_v27 = vld [vmem:[#allocation8 + $0x168] ss:$16 sps:$4 sm:$0xff]  }
 0x1e8   : > { %1232 = vmatpush1.bf16.msra.mxu0 %v2819_v29  ;;  %v2908_v29 = vld [vmem:[#allocation8 + $0x18c] ss:$16 sps:$4 sm:$0xff]  }
 0x1e9   : > { %2523 = vmatprep.subr.bf16.mxu0 %v2918_v44  ;;  %v2929_v44 = vld [vmem:[#allocation10 + $0x28] sm:$0xff]  }
 0x1eb   : > { %1234 = vmatmul.mubr.bf16.vlgmr.msra.gmra.mrb[4].mxu0 %v2957_v31  ;;  %v2906_v31 = vld [vmem:[#allocation8 + $0x188] ss:$16 sps:$4 sm:$0xff]  }
 0x1ec   : > { %2524 = vmatpush3.bf16.msra.mxu0 %v2919_v46  ;;  %v2930_v46 = vld [vmem:[#allocation10 + $0x70] sm:$0xff]  }
 0x1ed   : > { %2525 = vmatprep.subr.bf16.mxu0 %v2920_v47  ;;  %v2931_v47 = vld [vmem:[#allocation10 + $0x30] sm:$0xff]  }
 0x1f0   : > { %2526 = vmatpush3.bf16.msra.mxu0 %v2921_v48  ;;  %v2932_v48 = vld [vmem:[#allocation10 + $0x78] sm:$0xff]  }
 0x1f1   : > { %2527 = vmatprep.subr.bf16.mxu0 %v2922_v49  ;;  %v2933_v49 = vld [vmem:[#allocation10 + $0x38] sm:$0xff]  }
 0x1f4   : > { %2528 = vmatpush3.bf16.msra.mxu0 %v2923_v50  ;;  %v2934_v50 = vld [vmem:[#allocation10 + $0xc0] sm:$0xff]  }
 0x1f5   : > { %2529 = vmatprep.subr.bf16.mxu0 %v2924_v38 }
 0x1f8   : > { %2530 = vmatpush3.bf16.msra.mxu0 %v2925_v39 }
 0x1f9   : > { %2531 = vmatprep.subr.bf16.mxu0 %v2926_v40 }
 0x1fc   : > { %2532 = vmatpush3.bf16.msra.mxu0 %v2927_v41 }
 0x1fd   : > { %2533 = vmatprep.subr.bf16.mxu0 %v2928_v42 }
 0x200   : > { %2534 = vmatpush3.bf16.msra.mxu0 %v2929_v44 }
 0x201   : > { %2535 = vmatprep.subr.bf16.mxu0 %v2930_v46 }
 0x204   : > { %2536 = vmatpush3.bf16.msra.mxu0 %v2931_v47 }
 0x205   : > { %2537 = vmatprep.subr.bf16.mxu0 %v2932_v48 }
 0x208   : > { %2538 = vmatpush3.bf16.msra.mxu0 %v2933_v49 }
 0x2be   : > { %v1235_v53 = vpop.f32.mrb[4].mxu0 }
 0x2bf   : > { %v1237_v55 = vpop.f32.mrb[5].mxu0  ;;  %v2567_v57 = vadd.f32 %v1235_v53, %v831_v52  ;;  %v2937_v53 = vld [vmem:[#allocation10 + $0x88] sm:$0xff]  }
 0x2c0   : > { %v1239_v56 = vpop.f32.mrb[6].mxu0  ;;  %v2568_v60 = vadd.f32 %v1237_v55, %v835_v54  ;;  %v2939_v55 = vld [vmem:[#allocation10 + $0x90] sm:$0xff]  }
 0x2c1   : > { %v2569_v58 = vadd.f32 %v1239_v56, %v831_v52  ;;  %v1241_v59 = vpop.f32.mrb[7].mxu0  ;;  %v2936_v52 = vld [vmem:[#allocation10 + $0xc8] sm:$0xff]   ;;  %v2940_v56 = vld [vmem:[#allocation10 + $0xd8] sm:$0xff]  }
 0x2c2   : > { %v2570_v61 = vadd.f32 %v1241_v59, %v835_v54  ;;  %v2938_v54 = vld [vmem:[#allocation10 + $0xd0] sm:$0xff]   ;;  %v2943_v59 = vld [vmem:[#allocation10 + $0xa0] sm:$0xff]  }
 0x2c3   : > { %v1244_v62 = vpack.c.bf16 %v2569_v58, %v2567_v57  ;;  %v2941_v57 = vld [vmem:[#allocation10 + $0x98] sm:$0xff]   ;;  %v2942_v58 = vld [vmem:[#allocation10 + $0xe0] sm:$0xff]  }
 0x2c4   : > { %v1245_v63 = vpack.c.bf16 %v2570_v61, %v2568_v60  ;;  %v2944_v60 = vld [vmem:[#allocation10 + $0xe8] sm:$0xff]  }
 0x2c5   : > { %2958 = vtanh.bf16 %v1244_v62  ;;  %v2945_v61 = vld [vmem:[#allocation10 + $0xa8] sm:$0xff]   ;;  %v2946_v62 = vld [vmem:[#allocation10 + $0xf0] sm:$0xff]  }
 0x2c6   : > { %2960 = vtanh.bf16 %v1245_v63  ;;  %v2947_v63 = vld [vmem:[#allocation10 + $0xb0] sm:$0xff]  }
 0x2d0   : > { %v3564_v0 = vpop.eup %2958 }
 0x2d1   : > { %v2961_v2 = vpop.eup %2960 }
 0x2d2   : > { %1686 = vmatprep.mubr.bf16.mxu1 %v2961_v2  ;;  %v2506_v4 = vcombine.low %v3564_v0, %v2961_v2  ;;  %v2507_v5 = vcombine.high %v3564_v0, %v2961_v2 }
 0x2d3   : > { %1687 = vmatmul.mubr.bf16.vlgmr.msra.gmra.mrb[4].mxu1 %v3564_v0 }
 0x2d4   : > { %1698 = vmatpush1.bf16.msra.mxu1 %v2870_v1  ;;  %1729 = vmatprep.mubr.bf16.mxu1 %v2961_v2  ;;  %2105 = vst [vmem:[%s3571_s11] sm:$0xff] %v2506_v4  ;;  %2106 = vst [vmem:[%s3571_s11 + $0x8] sm:$0xff] %v2507_v5  ;;  %v2949_v1 = vld [vmem:[#allocation10 + $0xb8] sm:$0xff]   ;;  %v1312_v2 = vld [vmem:[%s3678_s6] sm:$0xf] }
 0x2d5   : > { %1699 = vmatprep.subr.bf16.mxu1 %v2875_v3  ;;  %v1317_v3 = vrot.slane %v1312_v2, %v3537_v28  ;;  %v1321_v5 = vrot.slane %v1312_v2, %v3543_v30  ;;  %v1325_v28 = vrot.slane %v1312_v2, %v498_v43  ;;  %v1329_v30 = vrot.slane %v1312_v2, %v502_v45 }
 0x2d8   : > { %1700 = vmatpush1.bf16.msra.mxu1 %v2873_v6 }
 0x2d9   : > { %1701 = vmatprep.subr.bf16.mxu1 %v2878_v7 }
 0x2dc   : > { %1702 = vmatpush1.bf16.msra.mxu1 %v2876_v8 }
 0x2dd   : > { %1703 = vmatprep.subr.bf16.mxu1 %v2881_v9 }
 0x2e0   : > { %1704 = vmatpush1.bf16.msra.mxu1 %v2879_v10 }
 0x2e1   : > { %1705 = vmatprep.subr.bf16.mxu1 %v2884_v11 }
 0x2e4   : > { %1706 = vmatpush1.bf16.msra.mxu1 %v2882_v12 }
 0x2e5   : > { %1707 = vmatprep.subr.bf16.mxu1 %v2887_v13 }
 0x2e8   : > { %1708 = vmatpush1.bf16.msra.mxu1 %v2885_v14 }
 0x2e9   : > { %1709 = vmatprep.subr.bf16.mxu1 %v2890_v15 }
 0x2ec   : > { %1710 = vmatpush1.bf16.msra.mxu1 %v2888_v16 }
 0x2ed   : > { %1711 = vmatprep.subr.bf16.mxu1 %v2893_v17 }
 0x2f0   : > { %1712 = vmatpush1.bf16.msra.mxu1 %v2891_v18 }
 0x2f1   : > { %1713 = vmatprep.subr.bf16.mxu1 %v2896_v19 }
 0x2f4   : > { %1714 = vmatpush1.bf16.msra.mxu1 %v2894_v20 }
 0x2f5   : > { %1715 = vmatprep.subr.bf16.mxu1 %v2899_v21 }
 0x2f8   : > { %1716 = vmatpush1.bf16.msra.mxu1 %v2897_v22 }
 0x2f9   : > { %1717 = vmatprep.subr.bf16.mxu1 %v2902_v23 }
 0x2fc   : > { %1718 = vmatpush1.bf16.msra.mxu1 %v2900_v24 }
 0x2fd   : > { %1719 = vmatprep.subr.bf16.mxu1 %v2905_v26 }
 0x300   : > { %1720 = vmatpush1.bf16.msra.mxu1 %v2903_v27 }
 0x301   : > { %1721 = vmatprep.subr.bf16.mxu1 %v2908_v29 }
 0x304   : > { %1722 = vmatpush1.bf16.msra.mxu1 %v2906_v31 }
 0x305   : > { %1723 = vmatprep.subr.bf16.mxu1 %v2911_v32 }
 0x308   : > { %1724 = vmatpush1.bf16.msra.mxu1 %v2909_v33 }
 0x309   : > { %1725 = vmatprep.subr.bf16.mxu1 %v2914_v34 }
 0x30c   : > { %1726 = vmatpush1.bf16.msra.mxu1 %v2912_v35 }
 0x30d   : > { %1727 = vmatprep.subr.bf16.mxu1 %v2917_v36 }
 0x310   : > { %1728 = vmatpush1.bf16.msra.mxu1 %v2915_v37 }
 0x311   : > { %2545 = vmatprep.subr.bf16.mxu1 %v2934_v50 }
 0x313   : > { %1730 = vmatmul.mubr.bf16.vlgmr.msra.gmra.mrb[8].mxu1 %v3564_v0  ;;  %v2948_v0 = vld [vmem:[#allocation10 + $0xf8] sm:$0xff]  }
 0x314   : > { %2546 = vmatpush3.bf16.msra.mxu1 %v2935_v51 }
 0x315   : > { %2547 = vmatprep.subr.bf16.mxu1 %v2936_v52 }
 0x318   : > { %2548 = vmatpush3.bf16.msra.mxu1 %v2937_v53 }
 0x319   : > { %2549 = vmatprep.subr.bf16.mxu1 %v2938_v54 }
 0x31c   : > { %2550 = vmatpush3.bf16.msra.mxu1 %v2939_v55 }
 0x31d   : > { %2551 = vmatprep.subr.bf16.mxu1 %v2940_v56 }
 0x320   : > { %2552 = vmatpush3.bf16.msra.mxu1 %v2941_v57 }
 0x321   : > { %2553 = vmatprep.subr.bf16.mxu1 %v2942_v58 }
 0x324   : > { %2554 = vmatpush3.bf16.msra.mxu1 %v2943_v59 }
 0x325   : > { %2555 = vmatprep.subr.bf16.mxu1 %v2944_v60 }
 0x328   : > { %2556 = vmatpush3.bf16.msra.mxu1 %v2945_v61 }
 0x329   : > { %2557 = vmatprep.subr.bf16.mxu1 %v2946_v62 }
 0x32c   : > { %2558 = vmatpush3.bf16.msra.mxu1 %v2947_v63 }
 0x32d   : > { %2559 = vmatprep.subr.bf16.mxu1 %v2948_v0 }
 0x330   : > { %2560 = vmatpush3.bf16.msra.mxu1 %v2949_v1 }
 0x3a6   : > { %v1688_v4 = vpop.f32.mrb[4].mxu1 }
 0x3a7   : > { %v1690_v6 = vpop.f32.mrb[5].mxu1  ;;  %v1689_v8 = vadd.f32 %v1688_v4, %v1317_v3 }
 0x3a8   : > { %v1692_v7 = vpop.f32.mrb[6].mxu1  ;;  %v1691_v11 = vadd.f32 %v1690_v6, %v1321_v5 }
 0x3a9   : > { %v1693_v9 = vadd.f32 %v1692_v7, %v1317_v3  ;;  %v1694_v10 = vpop.f32.mrb[7].mxu1 }
 0x3aa   : > { %v1695_v12 = vadd.f32 %v1694_v10, %v1321_v5 }
 0x3ab   : > { %v1740_v13 = vpack.c.bf16 %v1693_v9, %v1689_v8 }
 0x3ac   : > { %v1741_v14 = vpack.c.bf16 %v1695_v12, %v1691_v11 }
 0x3ae   : > { %2962 = vtanh.bf16 %v1741_v14 }
 0x3af   : > { %2964 = vtanh.bf16 %v1740_v13 }
 0x3b9   : > { %v2963_v15 = vpop.eup %2962 }
 0x3ba   : > { %v2965_v16 = vpop.eup %2964  ;;  %2043 = vmatprep.mubr.bf16.mxu0 %v2963_v15 }
 0x3bb   : > { %2044 = vmatmul.mubr.bf16.vlgmr.msra.gmra.mrb[8].mxu0 %v2965_v16 }
 0x3e6   : > { %v1731_v17 = vpop.f32.mrb[8].mxu1 }
 0x3e7   : > { %v1733_v18 = vpop.f32.mrb[9].mxu1  ;;  %v1732_v20 = vadd.f32 %v1731_v17, %v1325_v28 }
 0x3e8   : > { %v1735_v19 = vpop.f32.mrb[10].mxu1  ;;  %v1734_v23 = vadd.f32 %v1733_v18, %v1329_v30 }
 0x3e9   : > { %v1736_v21 = vadd.f32 %v1735_v19, %v1325_v28  ;;  %v1737_v22 = vpop.f32.mrb[11].mxu1 }
 0x3ea   : > { %v1738_v24 = vadd.f32 %v1737_v22, %v1329_v30 }
 0x3eb   : > { %v1742_v26 = vpack.c.bf16 %v1736_v21, %v1732_v20 }
 0x3ec   : > { %v1743_v27 = vpack.c.bf16 %v1738_v24, %v1734_v23 }
 0x3ee   : > { %2966 = vtanh.bf16 %v1743_v27 }
 0x3ef   : > { %2968 = vtanh.bf16 %v1742_v26 }
 0x3f9   : > { %v2967_v43 = vpop.eup %2966 }
 0x3fa   : > { %v2969_v29 = vpop.eup %2968  ;;  %2084 = vmatprep.mubr.bf16.mxu1 %v2967_v43 }
 0x3fb   : > { %2085 = vmatmul.mubr.bf16.vlgmr.msra.gmra.mrb[12].mxu1 %v2969_v29 }
 0x3fc   : > { %3127 = shalt.err (!%p3124_p13)
}
 0x3fd   : > { %s3128_s30 = scalar_lea.hbm %s3590_s23, 256  ;;  %s3132_s12 = scalar_lea.hbm %s3682_s10, 512 }
 0x3fe   : > { %p3129_p9 = scmp.ne.s32.totalorder %s3590_s23, %s3128_s30  ;;  %p3133_p4 = scmp.lt.u32.totalorder %s3590_s23, %s3682_s10 }
 0x3ff   : > { %p3134_p8 = scmp.lt.u32.totalorder %s3132_s12, %s3128_s30  ;;  %p3136_p10 = scmp.lt.u32.totalorder %s3128_s30, %s3590_s23 }
 0x400   : > { %p3130_p0 = pnand %p3129_p9, %p3460_p3 }
 0x401   : > { %p3135_p6 = por %p3134_p8, %p3133_p4 }
 0x402   : > { %p3131_p11 = pneg %p3130_p0 }
 0x403   : > { %p3137_p5 = por %p3136_p10, %p3135_p6 }
 0x405   : > { %p3138_p7 = pnand %p3137_p5, %p3131_p11 }
 0x407   : > { %3141 = shalt.err (!%p3138_p7)
}
 0x408   : > { %s3235_s28 = smov 128   ;;  %s3236_s9 = smov 8  }
 0x409   : > { %2594 = dma.vmem_to_hbm [thread:$0]  (%p3460_p3), %s3592_s29, 256, %s3590_s23, %s2122_s22, %s3235_s28, %s3235_s28, %s3236_s9  }
 0x40a   : > { %s3707_s26 = sld [smem:[#allocation21_spill]]  ;;  %s2311_s29 = sshll.u32 %s3512_s18, 3 }
 0x40b   : > { %s2520_s23 = sshll.u32 %s3316_s17, 7  ;;  %s439_s22 = scalar_lea.vmem [#allocation11], %s2311_s29 }
 0x40c   : > { %s2135_s30 = sshll.u32 %s439_s22, 4  ;;  %s3708_s12 = sld [smem:[#allocation22_spill]]  ;;  %s3628_s30 = int_to_ptr.vmem [resolvable:$true] %s2135_s30 }
 0x40d   : > { %s2117_s13 = scalar_lea.sflag [#allocation4], %s3512_s18  ;;  %s3142_s28 = scalar_lea.vmem %s3628_s30, 128 }
 0x40e   : > { %p3143_p12 = scmp.ne.s32.totalorder %s3628_s30, %s3142_s28  ;;  %s3237_s17 = smov [#allocation11]  }
 0x40f   : > { %s3146_s9 = sshll.u32 %s3237_s17, 4  ;;  %s3147_s9 = int_to_ptr.vmem [resolvable:$false] %s3146_s9 }
 0x410   : > { %v2473_v35 = vld [vmem:[%s3707_s26] ss:$0 sm:$0xff]  ;;  %p3144_p2 = pnand %p3143_p12, %p3460_p3  ;;  %s3148_s19 = scalar_lea.vmem %s3147_s9, 256 }
 0x411   : > { %p3149_p13 = scmp.lt.s32.totalorder %s3628_s30, %s3147_s9  ;;  %p3150_p9 = scmp.lt.s32.totalorder %s3148_s19, %s3142_s28 }
 0x412   : > { %s3626_s24 = scalar_lea.hbm %s3708_s12, %s2520_s23  ;;  %p3145_p1 = pneg %p3144_p2 }
 0x413   : > { %p3151_p0 = por %p3150_p9, %p3149_p13 }
 0x415   : > { %p3152_p11 = pnand %p3151_p0, %p3145_p1 }
 0x48e   : > { %v2539_v25 = vpop.f32.mrb[8].mxu0 }
 0x48f   : > { %v2540_v45 = vpop.f32.mrb[9].mxu0 }
 0x490   : > { %v2541_v31 = vadd.f32 %v2540_v45, %v2539_v25  ;;  %v2542_v32 = vpop.f32.mrb[10].mxu0 }
 0x491   : > { %v2543_v33 = vpop.f32.mrb[11].mxu0 }
 0x492   : > { %v2544_v34 = vadd.f32 %v2543_v33, %v2542_v32  ;;  %v2046_v38 = vadd.f32 %v2541_v31, %v2473_v35 }
 0x494   : > { %v2049_v42 = vadd.f32 %v2544_v34, %v2473_v35 }
 0x4ce   : > { %v2561_v36 = vpop.f32.mrb[12].mxu1 }
 0x4cf   : > { %v2562_v37 = vpop.f32.mrb[13].mxu1 }
 0x4d0   : > { %v2563_v39 = vadd.f32 %v2562_v37, %v2561_v36  ;;  %v2564_v40 = vpop.f32.mrb[14].mxu1 }
 0x4d1   : > { %v2565_v41 = vpop.f32.mrb[15].mxu1 }
 0x4d2   : > { %v2087_v44 = vadd.f32 %v2563_v39, %v2046_v38  ;;  %v2566_v46 = vadd.f32 %v2565_v41, %v2564_v40 }
 0x4d4   : > { %v2090_v47 = vadd.f32 %v2566_v46, %v2049_v42 }
 0x4d6   : > { %v2093_v48 = vpack.c.bf16 %v2090_v47, %v2087_v44 }
 0x4d8   : > { %2970 = vtanh.bf16 %v2093_v48 }
 0x4e3   : > { %v2971_v49 = vpop.eup %2970 }
 0x4e4   : > { %v2508_v50 = vcombine.low %v2971_v49, %v2971_v49  ;;  %v2509_v51 = vcombine.high %v2971_v49, %v2971_v49 }
 0x4e6   : > { %2114 = vst [vmem:[%s439_s22] sm:$0xf] %v2508_v50  ;;  %2115 = vst [vmem:[%s439_s22 + $0x4] sm:$0xf] %v2509_v51 }
 0x4e7   : > { %3155 = shalt.err (!%p3152_p11)
}
 0x4e8   : > { %s3156_s21 = scalar_lea.hbm %s3626_s24, 128  ;;  %s3160_s23 = scalar_lea.hbm %s3708_s12, 256 }
 0x4e9   : > { %p3157_p4 = scmp.ne.s32.totalorder %s3626_s24, %s3156_s21  ;;  %p3161_p10 = scmp.lt.u32.totalorder %s3626_s24, %s3708_s12 }
 0x4ea   : > { %p3162_p5 = scmp.lt.u32.totalorder %s3160_s23, %s3156_s21  ;;  %p3164_p12 = scmp.lt.u32.totalorder %s3156_s21, %s3626_s24 }
 0x4eb   : > { %p3158_p8 = pnand %p3157_p4, %p3460_p3 }
 0x4ec   : > { %p3163_p7 = por %p3162_p5, %p3161_p10 }
 0x4ed   : > { %p3159_p6 = pneg %p3158_p8 }
 0x4ee   : > { %p3165_p2 = por %p3164_p12, %p3163_p7 }
 0x4f0   : > { %p3166_p1 = pnand %p3165_p2, %p3159_p6 }
 0x4f2   : > { %3169 = shalt.err (!%p3166_p1)
}
 0x4f3   : > { %s3238_s8 = smov 64   ;;  %s3239_s28 = smov 4  }
 0x4f4   : > { %2593 = dma.vmem_to_hbm [thread:$0]  (%p3460_p3), %s3628_s30, 128, %s3626_s24, %s2117_s13, %s3238_s8, %s3238_s8, %s3239_s28  }
 0x4f5 PF: > { %s3709_s17 = sld [smem:[#allocation19_spill]]  ;;  %s3710_s9 = sld [smem:[#allocation20_spill]] }
 0x4f6   : > { %p3712_p9 = scmp.ge.s32.totalorder %s3220_s16, 2 }
 0x4fb   : > { %s2167_s19 = sand.u32 1, %s3709_s17   ;;  %p3711_p13 = scmp.ne.s32.totalorder %s3710_s9, 0 }
 0x4fc   : > { %s2168_s21 = scalar_lea.sflag [#allocation4], %s2167_s19 }
 0x4fd   : > { %p2615_p0 = pnand %p3712_p9, %p3711_p13 }
 0x4ff   : > { %3199 = dma.done.wait (!%p2615_p0), %s2168_s21, 128  }
 0x500   : > { %3201 = vsyncadd (!%p2615_p0), %s2168_s21, 4294967168  ;;  %s2177_s26 = scalar_lea.sflag [#allocation13], %s2167_s19 }
 0x501   : > { %3203 = dma.done.wait (!%p2615_p0), %s2177_s26, 256  }
 0x502   : > { %3205 = vsyncadd (!%p2615_p0), %s2177_s26, 4294967040  ;;  %p29_p3 = scmp.ge.s32.totalorder %s3447_s20, 4   ;;  %s3713_s13 = smov %s3212_s14 }
 0x503   : > { %s3714_s14 = smov %s3216_s15  ;;  %s3715_s15 = smov %s3456_s25 }
 0x504   : > { %s3716_s16 = smov %s3447_s20  ;;  %31 = sbr.rel (!%p29_p3) target bundleno = 12 (0xc), region = 134 }
 0x50b   :  { %2182 = vsyncpa [#allocation3], 1 }
 0x50c   :  { %2184 = vsyncpa [#allocation3 + $0x1], 1 }
 0x50d   :  { %2185 = vsyncpa [#allocation6], 1 }
 0x50e   :  { %2186 = vsyncpa [#allocation9], 1 }
 0x50f   :  { %2187 = vsyncpa [#allocation4], 1 }
 0x510   :  { %2189 = vsyncpa [#allocation4 + $0x1], 1 }
 0x511   :  { %2190 = vsyncpa [#allocation13], 1 }
 0x512   :  { %2192 = vsyncpa [#allocation13 + $0x1], 1 }

</bundles_post_ra>
